<compile_context>
chip_gen: v6e
topology: v6e:2x2x1
jax: 0.10.0
libtpu: 0.0.40
codegen_flags: <defaults>
</compile_context>

<pallas_src>
import functools

import jax
import jax.numpy as jnp
from jax.experimental import pallas as pl
from jax.experimental.pallas import tpu as pltpu


# --------------------------------------------------------------------------- #
# Pallas kernel: fused Conv(KxK) + bias + ReLU + BatchNorm affine.
# --------------------------------------------------------------------------- #
def _conv_relu_bn_kernel(x_ref, w_ref, b_ref, scale_ref, shift_ref, o_ref,
                         acc_ref, *, k, parity, hh):
    # x_ref:     (NB, X1, X2, Cin)  activation block (padded image, parity slabs,
    #                               or im2col columns -- see wrapper)
    # w_ref:     (K, K, Cin, T_CO)  bf16 weights for this Cout tile
    # b_ref:     (1, T_CO)          conv bias (f32)
    # scale_ref: (1, T_CO)          folded BN scale (ones if no BN)
    # shift_ref: (1, T_CO)          folded BN shift (zeros if no BN)
    # o_ref:     (NB, Ho, Wo, T_CO)
    # acc_ref:   (NB*Ho*Wo, T_CO)   f32 VMEM accumulator scratch
    nb, ho, wo, _ = o_ref.shape
    cin = w_ref.shape[2]
    m = nb * ho * wo

    acc_ref[...] = jnp.zeros_like(acc_ref)
    for kh in range(k):
        for kw in range(k):
            if parity:
                # Input rows hold the 4 (h,w)-parity slabs of the padded image
                # stacked along axis 1; tap (kh, kw) is a contiguous window of
                # slab 2*(kh%2)+(kw%2).  No strided reads.
                r0 = (2 * (kh % 2) + (kw % 2)) * hh + kh // 2
                c0 = kw // 2
            else:
                r0, c0 = kh, kw
            patch = x_ref[:, pl.ds(r0, ho), pl.ds(c0, wo), :]       # (NB,Ho,Wo,Cin)
            acc_ref[...] += jnp.dot(                                # bf16 MXU, f32 acc
                patch.reshape(m, cin), w_ref[kh, kw],
                preferred_element_type=jnp.float32)

    y = jnp.maximum(acc_ref[...] + b_ref[...], 0.0)   # conv bias + ReLU   (f32)
    y = y * scale_ref[...] + shift_ref[...]           # folded BN affine   (f32)
    o_ref[...] = y.reshape(o_ref.shape).astype(o_ref.dtype)


# --------------------------------------------------------------------------- #
# Wrapper-side layout plumbing (pure copies/gathers; all FLOPs stay in-kernel).
# --------------------------------------------------------------------------- #
def _im2col_s2(x, k, stride, pad):
    """(N,H,W,C) -> (N,Ho,Wo,K*K*C): fold the taps of the first (tiny-Cin) layer
    into the channel axis so the conv becomes one lane-dense 1x1-conv matmul."""
    n, h, w, c = x.shape
    ho = (h + 2 * pad - k) // stride + 1
    wo = (w + 2 * pad - k) // stride + 1
    xp = jnp.pad(x, ((0, 0), (pad, pad), (pad, pad), (0, 0)))
    cols = [xp[:, kh:kh + stride * ho:stride, kw:kw + stride * wo:stride, :]
            for kh in range(k) for kw in range(k)]
    return jnp.concatenate(cols, axis=-1)


def _parity_slabs(x, pad):
    """(N,H,W,C) -> (N, 4*Hh, Wh, C) with Hh=(H+2p)/2: the four (h,w)-parity slabs
    of the padded input, stacked along rows.  Built once per stride-2 layer so every
    in-kernel tap is a contiguous (unstrided) read."""
    xp = jnp.pad(x, ((0, 0), (pad, pad), (pad, pad), (0, 0)))
    assert xp.shape[1] % 2 == 0 and xp.shape[2] % 2 == 0
    slabs = [xp[:, ph::2, pw::2, :] for ph in (0, 1) for pw in (0, 1)]
    return jnp.concatenate(slabs, axis=1)


def _conv_call(x_in, w_in, b, scale, shift, *, ho, wo, parity, hh, out_dtype):
    n = x_in.shape[0]
    k = w_in.shape[0]
    cin = w_in.shape[2]
    cout = w_in.shape[3]

    # Cout tiling: keeps bf16 weight blocks small (512-wide layers -> 256 tile)
    # and exposes parallel grid work for v7x's two TensorCores.
    t_co = cout if cout <= 256 else 256
    n_co = cout // t_co

    # Fold the whole batch into the matmul M dimension for small-spatial layers.
    fold_batch = n * ho * wo <= 1024
    nb = n if fold_batch else 1
    m = nb * ho * wo

    x_in = x_in.astype(jnp.bfloat16)
    w_in = w_in.astype(jnp.bfloat16)
    b2 = b.reshape(1, cout).astype(jnp.float32)
    sc2 = scale.reshape(1, cout).astype(jnp.float32)
    sh2 = shift.reshape(1, cout).astype(jnp.float32)

    x_block = (nb,) + x_in.shape[1:]
    out_bytes = (2 if out_dtype == jnp.bfloat16 else 4) * n * ho * wo * cout
    flops = 2 * n * ho * wo * k * k * cin * cout
    bytes_accessed = 2 * x_in.size + 2 * w_in.size * (n // nb) + out_bytes + 12 * cout

    kernel = functools.partial(_conv_relu_bn_kernel, k=k, parity=parity, hh=hh)
    return pl.pallas_call(
        kernel,
        out_shape=jax.ShapeDtypeStruct((n, ho, wo, cout), out_dtype),
        grid=(n // nb, n_co),
        in_specs=[
            pl.BlockSpec(x_block, lambda i, j: (i, 0, 0, 0)),
            pl.BlockSpec((k, k, cin, t_co), lambda i, j: (0, 0, 0, j)),
            pl.BlockSpec((1, t_co), lambda i, j: (0, j)),
            pl.BlockSpec((1, t_co), lambda i, j: (0, j)),
            pl.BlockSpec((1, t_co), lambda i, j: (0, j)),
        ],
        out_specs=pl.BlockSpec((nb, ho, wo, t_co), lambda i, j: (i, 0, 0, j)),
        scratch_shapes=[pltpu.VMEM((m, t_co), jnp.float32)],
        compiler_params=pltpu.CompilerParams(
            dimension_semantics=("parallel", "parallel")),
        cost_estimate=pl.CostEstimate(
            flops=flops, transcendentals=0, bytes_accessed=bytes_accessed),
    )(x_in, w_in, b2, sc2, sh2)


def conv_relu_bn(x_nhwc, w, b, scale, shift, *, stride, pad,
                 out_dtype=jnp.bfloat16):
    """One fused Conv2d(k, stride, pad) + ReLU + BN-affine layer (NHWC in/out)."""
    n, h, wd, cin = x_nhwc.shape
    k = w.shape[0]
    cout = w.shape[3]
    ho = (h + 2 * pad - k) // stride + 1
    wo = (wd + 2 * pad - k) // stride + 1

    if stride == 1:
        x_in = jnp.pad(x_nhwc, ((0, 0), (pad, pad), (pad, pad), (0, 0)))
        w_in, parity, hh = w, False, 0
    elif k * k * cin <= 128:
        # First layer: tiny Cin -> im2col so the single contraction is lane-dense.
        x_in = _im2col_s2(x_nhwc, k, stride, pad)
        w_in = w.reshape(1, 1, k * k * cin, cout)
        parity, hh = False, 0
    else:
        # Remaining stride-2 layers: pre-split padded input into parity slabs once.
        x_in = _parity_slabs(x_nhwc, pad)
        w_in, parity, hh = w, True, (h + 2 * pad) // 2
    return _conv_call(x_in, w_in, b, scale, shift, ho=ho, wo=wo,
                      parity=parity, hh=hh, out_dtype=out_dtype)


# --------------------------------------------------------------------------- #
# Model definition / parameters (mirrors FeatureExtraction + init_weights).
# --------------------------------------------------------------------------- #
def _layer_specs(input_nc, ngf=64, n_layers=3):
    """(Cin, Cout, K, stride, pad, has_bn) per layer, matching FeatureExtraction."""
    specs = [(input_nc, ngf, 4, 2, 1, True)]
    for i in range(n_layers):
        in_ngf = 2 ** i * ngf if 2 ** i * ngf < 512 else 512
        out_ngf = 2 ** (i + 1) * ngf if 2 ** i * ngf < 512 else 512
        specs.append((in_ngf, out_ngf, 4, 2, 1, True))
    specs.append((512, 512, 3, 1, 1, True))
    specs.append((512, 512, 3, 1, 1, False))   # last conv: ReLU only, no norm
    return specs


def init_feature_extraction_params(key, input_nc, ngf=64, n_layers=3):
    """Random parameters mirroring init_weights(init_type='normal'):
    conv W ~ N(0, 0.02), bias 0, BN gamma ~ N(1, 0.02), beta 0; running stats
    (mean 0, var 1) folded into a per-channel (scale, shift)."""
    eps = 1e-5
    params = []
    for (cin, cout, k, s, p, has_bn) in _layer_specs(input_nc, ngf, n_layers):
        key, kw, kg = jax.random.split(key, 3)
        w = 0.02 * jax.random.normal(kw, (k, k, cin, cout), jnp.float32)
        b = jnp.zeros((cout,), jnp.float32)
        if has_bn:
            gamma = 1.0 + 0.02 * jax.random.normal(kg, (cout,), jnp.float32)
            beta = jnp.zeros((cout,), jnp.float32)
            running_mean = jnp.zeros((cout,), jnp.float32)
            running_var = jnp.ones((cout,), jnp.float32)
            scale = gamma / jnp.sqrt(running_var + eps)
            shift = beta - running_mean * scale
        else:
            scale = jnp.ones((cout,), jnp.float32)
            shift = jnp.zeros((cout,), jnp.float32)
        params.append((w, b, scale, shift, s, p))
    return params


def feature_extraction_forward(x_nchw, params):
    """Pallas equivalent of FeatureExtraction.forward (NCHW in, NCHW out)."""
    x = jnp.transpose(x_nchw, (0, 2, 3, 1)).astype(jnp.bfloat16)   # NCHW->NHWC once
    for li, (w, b, scale, shift, stride, pad) in enumerate(params):
        last = li == len(params) - 1
        x = conv_relu_bn(x, w, b, scale, shift, stride=stride, pad=pad,
                         out_dtype=jnp.float32 if last else jnp.bfloat16)
    return jnp.transpose(x, (0, 3, 1, 2))                          # back to NCHW once


def _feature_extraction_ref(x_nchw, params):
    """Pure-JAX reference mirroring the PyTorch module (inference-mode BN) at the
    same operand precision as the kernel: bf16 conv operands, f32 accumulation,
    f32 epilogue."""
    x = jnp.transpose(x_nchw, (0, 2, 3, 1)).astype(jnp.float32)
    for (w, b, scale, shift, stride, pad) in params:
        y = jax.lax.conv_general_dilated(
            x.astype(jnp.bfloat16), w.astype(jnp.bfloat16),
            window_strides=(stride, stride),
            padding=[(pad, pad), (pad, pad)],
            dimension_numbers=("NHWC", "HWIO", "NHWC"),
            preferred_element_type=jnp.float32)
        y = jnp.maximum(y + b, 0.0)
        x = y * scale + shift
    return jnp.transpose(x, (0, 3, 1, 2))


if __name__ == "__main__":
    key = jax.random.PRNGKey(0)
    kx, kp = jax.random.split(key)

    # Small but architecture-consistent shapes: batch=2, input_nc=3, 32x32
    # (spatial must be divisible by 16 for the four stride-2 layers).
    B, C, H, W = 2, 3, 32, 32
    x = jax.random.normal(kx, (B, C, H, W), jnp.float32)
    params = init_feature_extraction_params(kp, input_nc=C, ngf=64, n_layers=3)

    out = jax.block_until_ready(feature_extraction_forward(x, params))
    ref = _feature_extraction_ref(x, params)

    assert out.shape == (B, 512, H // 16, W // 16), out.shape
    assert out.dtype == jnp.float32
    err = float(jnp.max(jnp.abs(out - ref)))
    assert jnp.allclose(out, ref, atol=1e-2, rtol=1e-2), f"mismatch vs reference: {err}"

    print("KERNEL_OK")
</pallas_src>

<mosaic_0001>
module attributes {stable_mosaic.version = 11 : i64} {
  func.func @_conv_relu_bn_kernel(%arg0: i32, %arg1: i32, %arg2: memref<2x16x16x48xbf16, #tpu.memory_space<vmem>>, %arg3: memref<1x1x48x64xbf16, #tpu.memory_space<vmem>>, %arg4: memref<1x64xf32, #tpu.memory_space<vmem>>, %arg5: memref<1x64xf32, #tpu.memory_space<vmem>>, %arg6: memref<1x64xf32, #tpu.memory_space<vmem>>, %arg7: memref<2x16x16x64xbf16, #tpu.memory_space<vmem>>, %arg8: memref<512x64xf32, #tpu.memory_space<vmem>>) attributes {dimension_semantics = [#tpu.dimension_semantics<parallel>, #tpu.dimension_semantics<parallel>], iteration_bounds = array<i64: 1, 1>, scalar_prefetch = 0 : i64, scratch_operands = 1 : i64, tpu.core_type = #tpu.core_type<tc>, window_params = [{transform_indices = @transform_0, window_bounds = array<i64: 2, 16, 16, 48>}, {transform_indices = @transform_1, window_bounds = array<i64: 1, 1, 48, 64>}, {transform_indices = @transform_2, window_bounds = array<i64: 1, 64>}, {transform_indices = @transform_3, window_bounds = array<i64: 1, 64>}, {transform_indices = @transform_4, window_bounds = array<i64: 1, 64>}, {transform_indices = @transform_5, window_bounds = array<i64: 2, 16, 16, 64>}]} {
    %cst = arith.constant 0.000000e+00 : f32
    %0 = vector.broadcast %cst : f32 to vector<512x64xf32>
    %c0 = arith.constant 0 : index
    %c0_0 = arith.constant 0 : index
    %1 = vector.load %arg8[%c0, %c0_0] : memref<512x64xf32, #tpu.memory_space<vmem>>, vector<512x64xf32>
    tpu.vector_store %arg8[%c0, %c0_0], %0 {strides = array<i32>} : memref<512x64xf32, #tpu.memory_space<vmem>>, vector<512x64xf32>,
    %c0_1 = arith.constant 0 : index
    %c0_2 = arith.constant 0 : index
    %c0_3 = arith.constant 0 : index
    %c0_4 = arith.constant 0 : index
    %2 = vector.load %arg2[%c0_1, %c0_2, %c0_3, %c0_4] : memref<2x16x16x48xbf16, #tpu.memory_space<vmem>>, vector<2x16x16x48xbf16>
    %c0_5 = arith.constant 0 : index
    %c0_6 = arith.constant 0 : index
    %3 = vector.load %arg8[%c0_5, %c0_6] : memref<512x64xf32, #tpu.memory_space<vmem>>, vector<512x64xf32>
    %4 = vector.shape_cast %2 : vector<2x16x16x48xbf16> to vector<512x48xbf16>
    %c0_7 = arith.constant 0 : index
    %c0_8 = arith.constant 0 : index
    %c0_9 = arith.constant 0 : index
    %c0_10 = arith.constant 0 : index
    %5 = vector.load %arg3[%c0_7, %c0_8, %c0_9, %c0_10] : memref<1x1x48x64xbf16, #tpu.memory_space<vmem>>, vector<1x1x48x64xbf16>
    %6 = vector.shape_cast %5 : vector<1x1x48x64xbf16> to vector<48x64xbf16>
    %cst_11 = arith.constant dense<0.000000e+00> : vector<512x64xf32>
    %7 = tpu.matmul %4, %6, %cst_11 {dimension_numbers = #tpu.dot_dimension_numbers<[1], [0], [0], [1], [0, 0, 1, 1], [], []>} : vector<512x48xbf16>, vector<48x64xbf16>, vector<512x64xf32> -> vector<512x64xf32>
    %8 = arith.addf %3, %7 : vector<512x64xf32>
    %c0_12 = arith.constant 0 : index
    %c0_13 = arith.constant 0 : index
    %9 = vector.load %arg8[%c0_12, %c0_13] : memref<512x64xf32, #tpu.memory_space<vmem>>, vector<512x64xf32>
    tpu.vector_store %arg8[%c0_12, %c0_13], %8 {strides = array<i32>} : memref<512x64xf32, #tpu.memory_space<vmem>>, vector<512x64xf32>,
    %c0_14 = arith.constant 0 : index
    %c0_15 = arith.constant 0 : index
    %10 = vector.load %arg8[%c0_14, %c0_15] : memref<512x64xf32, #tpu.memory_space<vmem>>, vector<512x64xf32>
    %c0_16 = arith.constant 0 : index
    %c0_17 = arith.constant 0 : index
    %11 = vector.load %arg4[%c0_16, %c0_17] : memref<1x64xf32, #tpu.memory_space<vmem>>, vector<1x64xf32>
    %12 = vector.broadcast %11 : vector<1x64xf32> to vector<512x64xf32>
    %13 = arith.addf %10, %12 : vector<512x64xf32>
    %cst_18 = arith.constant 0.000000e+00 : f32
    %14 = vector.broadcast %cst_18 : f32 to vector<512x64xf32>
    %15 = arith.maximumf %13, %14 : vector<512x64xf32>
    %c0_19 = arith.constant 0 : index
    %c0_20 = arith.constant 0 : index
    %16 = vector.load %arg5[%c0_19, %c0_20] : memref<1x64xf32, #tpu.memory_space<vmem>>, vector<1x64xf32>
    %17 = vector.broadcast %16 : vector<1x64xf32> to vector<512x64xf32>
    %18 = arith.mulf %15, %17 : vector<512x64xf32>
    %c0_21 = arith.constant 0 : index
    %c0_22 = arith.constant 0 : index
    %19 = vector.load %arg6[%c0_21, %c0_22] : memref<1x64xf32, #tpu.memory_space<vmem>>, vector<1x64xf32>
    %20 = vector.broadcast %19 : vector<1x64xf32> to vector<512x64xf32>
    %21 = arith.addf %18, %20 : vector<512x64xf32>
    %22 = vector.shape_cast %21 : vector<512x64xf32> to vector<2x16x16x64xf32>
    %23 = arith.truncf %22 : vector<2x16x16x64xf32> to vector<2x16x16x64xbf16>
    %c0_23 = arith.constant 0 : index
    %c0_24 = arith.constant 0 : index
    %c0_25 = arith.constant 0 : index
    %c0_26 = arith.constant 0 : index
    %24 = vector.load %arg7[%c0_23, %c0_24, %c0_25, %c0_26] : memref<2x16x16x64xbf16, #tpu.memory_space<vmem>>, vector<2x16x16x64xbf16>
    tpu.vector_store %arg7[%c0_23, %c0_24, %c0_25, %c0_26], %23 {strides = array<i32>} : memref<2x16x16x64xbf16, #tpu.memory_space<vmem>>, vector<2x16x16x64xbf16>,
    return
  }
  func.func @transform_0(%arg0: i32, %arg1: i32) -> (i32, i32, i32, i32) {
    %c0_i32 = arith.constant 0 : i32
    %c0_i32_0 = arith.constant 0 : i32
    %c0_i32_1 = arith.constant 0 : i32
    %c0_i32_2 = arith.constant 0 : i32
    return %arg0, %c0_i32, %c0_i32_0, %c0_i32_1 : i32, i32, i32, i32
  }
  func.func @transform_1(%arg0: i32, %arg1: i32) -> (i32, i32, i32, i32) {
    %c0_i32 = arith.constant 0 : i32
    %c0_i32_0 = arith.constant 0 : i32
    %c0_i32_1 = arith.constant 0 : i32
    %c0_i32_2 = arith.constant 0 : i32
    return %c0_i32, %c0_i32_0, %c0_i32_1, %arg1 : i32, i32, i32, i32
  }
  func.func @transform_2(%arg0: i32, %arg1: i32) -> (i32, i32) {
    %c0_i32 = arith.constant 0 : i32
    %c0_i32_0 = arith.constant 0 : i32
    return %c0_i32, %arg1 : i32, i32
  }
  func.func @transform_3(%arg0: i32, %arg1: i32) -> (i32, i32) {
    %c0_i32 = arith.constant 0 : i32
    %c0_i32_0 = arith.constant 0 : i32
    return %c0_i32, %arg1 : i32, i32
  }
  func.func @transform_4(%arg0: i32, %arg1: i32) -> (i32, i32) {
    %c0_i32 = arith.constant 0 : i32
    %c0_i32_0 = arith.constant 0 : i32
    return %c0_i32, %arg1 : i32, i32
  }
  func.func @transform_5(%arg0: i32, %arg1: i32) -> (i32, i32, i32, i32) {
    %c0_i32 = arith.constant 0 : i32
    %c0_i32_0 = arith.constant 0 : i32
    %c0_i32_1 = arith.constant 0 : i32
    return %arg0, %c0_i32, %c0_i32_0, %arg1 : i32, i32, i32, i32
  }
}

</mosaic_0001>

<bundles_post_ra>
// kernel: tpu_custom_call.1
= control target key start
LH: loop header
LB: loop body
LE: loop exit
PB: predicated region body
PF: predicated region fallthrough
CT: control target
= control target key end

     0   :  { %10 = vsyncpa [#allocation4], 0  ;;  %s2700_s0 = inlined_call_operand.hbm [shape: bf16[2,16,16,48], index: 0, kind: input, shape index: {}]   ;;  %s2701_s1 = inlined_call_operand.hbm [shape: bf16[1,1,48,64], index: 1, kind: input, shape index: {}]   ;;  %s2702_s2 = inlined_call_operand.vmem [shape: f32[1,64], index: 2, kind: input, shape index: {}]   ;;  %s2703_s3 = inlined_call_operand.vmem [shape: f32[1,64], index: 3, kind: input, shape index: {}]   ;;  %s2704_s4 = inlined_call_operand.vmem [shape: f32[1,64], index: 4, kind: input, shape index: {}]   ;;  %s2705_s5 = inlined_call_operand.hbm [shape: bf16[2,16,16,64], index: 5, kind: output, shape index: {}]  }
   0x1   :  { %11 = vsyncpa [#allocation7], 0 }
   0x2   :  { %12 = vsyncpa [#allocation5], 0  ;;  %s2040_s18 = smov [#allocation3]  }
   0x3   :  { %s18_s19 = sshll.u32 %s2040_s18, 4  ;;  %s19_s19 = int_to_ptr.vmem [resolvable:$true] %s18_s19 }
   0x4   :  { %s1982_s20 = scalar_lea.vmem %s19_s19, 4096  ;;  %p1987_p1 = scmp.lt.s32.totalorder %s19_s19, %s19_s19 }
   0x5   :  { %p1983_p0 = scmp.ne.s32.totalorder %s19_s19, %s1982_s20  ;;  %p1988_p2 = scmp.lt.s32.totalorder %s1982_s20, %s1982_s20 }
   0x7   :  { %p1989_p3 = por %p1988_p2, %p1987_p1 }
   0x9   :  { %p1990_p4 = pnand %p1989_p3, %p1983_p0 }
   0xb   :  { %1993 = shalt.err (!%p1990_p4)
}
   0xc   :  { %s2041_s21 = smov 64   ;;  %s2042_s22 = smov 4  }
   0xd   :  { %24 = dma.hbm_to_vmem [thread:$0]  %s2700_s0, 4096, %s19_s19, [#allocation4], %s2041_s21, %s2041_s21, %s2042_s22  }
   0xe   :  { %s2043_s25 = smov [#allocation6]  }
   0xf   :  { %s30_s26 = sshll.u32 %s2043_s25, 4  ;;  %s31_s26 = int_to_ptr.vmem [resolvable:$true] %s30_s26 }
  0x10   :  { %s2002_s27 = scalar_lea.vmem %s31_s26, 384  ;;  %p2007_p6 = scmp.lt.s32.totalorder %s31_s26, %s31_s26 }
  0x11   :  { %p2003_p5 = scmp.ne.s32.totalorder %s31_s26, %s2002_s27  ;;  %p2008_p7 = scmp.lt.s32.totalorder %s2002_s27, %s2002_s27 }
  0x13   :  { %p2009_p8 = por %p2008_p7, %p2007_p6 }
  0x15   :  { %p2010_p9 = pnand %p2009_p8, %p2003_p5 }
  0x17   :  { %2013 = shalt.err (!%p2010_p9)
}
  0x18   :  { %36 = dma.hbm_to_vmem [thread:$0]  %s2701_s1, 384, %s31_s26, [#allocation7], %s2041_s21, %s2041_s21, %s2042_s22  }
  0x19   :  { %2034 = dma.done.wait [#allocation4], 4096  }
  0x1a   :  { %2035 = vsyncadd [#allocation4], 4294963200 }
  0x1b   :  { %2036 = dma.done.wait [#allocation7], 384  }
  0x1c   :  { %2037 = vsyncadd [#allocation7], 4294966912  ;;  %vm50_vm0 = vcmask 523264   ;;  %v2044_v0 = vmov 0.0   ;;  %v1936_v1 = vld [vmem:[#allocation6 + $0x10] sm:$0xff]   ;;  %v1937_v2 = vld [vmem:[#allocation6 + $0x8] sm:$0xff]  }
  0x1d   :  { %53 = vst.msk [vmem:[#allocation2 + $0x10] sm:$0xff] %vm50_vm0, %v2044_v0  ;;  %51 = vst.msk [vmem:[#allocation2] sm:$0xff] %vm50_vm0, %v2044_v0  ;;  %1854 = vmatprep.subr.bf16.mxu0 %v1936_v1  ;;  %1924 = vmatprep.subr.bf16.mxu1 %v1936_v1  ;;  %v1938_v3 = vld [vmem:[#allocation6] sm:$0xff]   ;;  %vm427_vm1 = vcmask 392192   ;;  %v1941_v6 = vld [vmem:[#allocation3 + $0x8] sm:$0xff]   ;;  %vm1538_vm2 = vcmask 519168  }
  0x1e   :  { %52 = vst.msk [vmem:[#allocation2 + $0x8] sm:$0xff] %vm50_vm0, %v2044_v0  ;;  %54 = vst.msk [vmem:[#allocation2 + $0x18] sm:$0xff] %vm50_vm0, %v2044_v0  ;;  %1855 = vmatpush3.bf16.msra.mxu0 %v1936_v1  ;;  %1927 = vmatpush3.bf16.msra.mxu1 %v1936_v1  ;;  %v1939_v4 = vld [vmem:[#allocation3] sm:$0xff]   ;;  %v1942_v7 = vld [vmem:[#allocation3 + $0x88] sm:$0xff]  }
  0x1f   :  { %55 = vst.msk [vmem:[#allocation2 + $0x20] sm:$0xff] %vm50_vm0, %v2044_v0  ;;  %56 = vst.msk [vmem:[#allocation2 + $0x28] sm:$0xff] %vm50_vm0, %v2044_v0  ;;  %1856 = vmatprep.subr.bf16.mxu0 %v1937_v2  ;;  %1925 = vmatprep.subr.bf16.mxu1 %v1937_v2  ;;  %v1940_v5 = vld [vmem:[#allocation3 + $0x80] sm:$0xff]   ;;  %v1943_v8 = vld [vmem:[#allocation3 + $0x10] sm:$0xff]  }
  0x20   :  { %57 = vst.msk [vmem:[#allocation2 + $0x30] sm:$0xff] %vm50_vm0, %v2044_v0  ;;  %58 = vst.msk [vmem:[#allocation2 + $0x38] sm:$0xff] %vm50_vm0, %v2044_v0  ;;  %1860 = vmatprep.mubr.msk.bf16.mxu0 %vm427_vm1, %v1939_v4  ;;  %1892 = vmatprep.mubr.msk.bf16.mxu1 %vm427_vm1, %v1940_v5  ;;  %v1944_v9 = vld [vmem:[#allocation3 + $0x90] sm:$0xff]   ;;  %v1945_v10 = vld [vmem:[#allocation3 + $0x18] sm:$0xff]  }
  0x21   :  { %59 = vst.msk [vmem:[#allocation2 + $0x40] sm:$0xff] %vm50_vm0, %v2044_v0  ;;  %60 = vst.msk [vmem:[#allocation2 + $0x48] sm:$0xff] %vm50_vm0, %v2044_v0  ;;  %v1946_v11 = vld [vmem:[#allocation3 + $0x98] sm:$0xff]   ;;  %v1947_v12 = vld [vmem:[#allocation3 + $0x20] sm:$0xff]  }
  0x22   :  { %61 = vst.msk [vmem:[#allocation2 + $0x50] sm:$0xff] %vm50_vm0, %v2044_v0  ;;  %62 = vst.msk [vmem:[#allocation2 + $0x58] sm:$0xff] %vm50_vm0, %v2044_v0  ;;  %1857 = vmatpush3.bf16.msra.mxu0 %v1937_v2  ;;  %1928 = vmatpush3.bf16.msra.mxu1 %v1937_v2  ;;  %v1948_v13 = vld [vmem:[#allocation3 + $0xa0] sm:$0xff]   ;;  %v1949_v14 = vld [vmem:[#allocation3 + $0x28] sm:$0xff]  }
  0x23   :  { %63 = vst.msk [vmem:[#allocation2 + $0x60] sm:$0xff] %vm50_vm0, %v2044_v0  ;;  %64 = vst.msk [vmem:[#allocation2 + $0x68] sm:$0xff] %vm50_vm0, %v2044_v0  ;;  %1858 = vmatprep.subr.bf16.mxu0 %v1938_v3  ;;  %1926 = vmatprep.subr.bf16.mxu1 %v1938_v3  ;;  %v1950_v15 = vld [vmem:[#allocation3 + $0xa8] sm:$0xff]   ;;  %v1951_v16 = vld [vmem:[#allocation3 + $0x30] sm:$0xff]  }
  0x24   :  { %65 = vst.msk [vmem:[#allocation2 + $0x70] sm:$0xff] %vm50_vm0, %v2044_v0  ;;  %66 = vst.msk [vmem:[#allocation2 + $0x78] sm:$0xff] %vm50_vm0, %v2044_v0  ;;  %v1952_v17 = vld [vmem:[#allocation3 + $0xb0] sm:$0xff]   ;;  %v1953_v18 = vld [vmem:[#allocation3 + $0x38] sm:$0xff]  }
  0x25   :  { %67 = vst.msk [vmem:[#allocation2 + $0x80] sm:$0xff] %vm50_vm0, %v2044_v0  ;;  %68 = vst.msk [vmem:[#allocation2 + $0x88] sm:$0xff] %vm50_vm0, %v2044_v0  ;;  %v1954_v19 = vld [vmem:[#allocation3 + $0xb8] sm:$0xff]   ;;  %v1955_v20 = vld [vmem:[#allocation3 + $0x40] sm:$0xff]  }
  0x26   :  { %69 = vst.msk [vmem:[#allocation2 + $0x90] sm:$0xff] %vm50_vm0, %v2044_v0  ;;  %70 = vst.msk [vmem:[#allocation2 + $0x98] sm:$0xff] %vm50_vm0, %v2044_v0  ;;  %1859 = vmatpush3.bf16.msra.mxu0 %v1938_v3  ;;  %1929 = vmatpush3.bf16.msra.mxu1 %v1938_v3  ;;  %v1956_v21 = vld [vmem:[#allocation3 + $0xc0] sm:$0xff]   ;;  %v1957_v22 = vld [vmem:[#allocation3 + $0x48] sm:$0xff]  }
  0x27   :  { %71 = vst.msk [vmem:[#allocation2 + $0xa0] sm:$0xff] %vm50_vm0, %v2044_v0  ;;  %72 = vst.msk [vmem:[#allocation2 + $0xa8] sm:$0xff] %vm50_vm0, %v2044_v0  ;;  %v1958_v23 = vld [vmem:[#allocation3 + $0xc8] sm:$0xff]   ;;  %v1959_v24 = vld [vmem:[#allocation3 + $0x50] sm:$0xff]  }
  0x28   :  { %73 = vst.msk [vmem:[#allocation2 + $0xb0] sm:$0xff] %vm50_vm0, %v2044_v0  ;;  %74 = vst.msk [vmem:[#allocation2 + $0xb8] sm:$0xff] %vm50_vm0, %v2044_v0  ;;  %v1960_v25 = vld [vmem:[#allocation3 + $0xd0] sm:$0xff]   ;;  %v1961_v26 = vld [vmem:[#allocation3 + $0x58] sm:$0xff]  }
  0x29   :  { %75 = vst.msk [vmem:[#allocation2 + $0xc0] sm:$0xff] %vm50_vm0, %v2044_v0  ;;  %76 = vst.msk [vmem:[#allocation2 + $0xc8] sm:$0xff] %vm50_vm0, %v2044_v0  ;;  %1861 = vmatmul.mubr.msk.bf16.vlgmr.msra.gmra.mxu0 %vm427_vm1, %v1941_v6  ;;  %1893 = vmatmul.mubr.msk.bf16.vlgmr.msra.gmra.mxu1 %vm427_vm1, %v1942_v7  ;;  %v1962_v27 = vld [vmem:[#allocation3 + $0xd8] sm:$0xff]   ;;  %v1963_v28 = vld [vmem:[#allocation3 + $0x60] sm:$0xff]  }
  0x2a   :  { %77 = vst.msk [vmem:[#allocation2 + $0xd0] sm:$0xff] %vm50_vm0, %v2044_v0  ;;  %78 = vst.msk [vmem:[#allocation2 + $0xd8] sm:$0xff] %vm50_vm0, %v2044_v0  ;;  %1864 = vmatprep.mubr.msk.bf16.mxu0 %vm427_vm1, %v1943_v8  ;;  %1896 = vmatprep.mubr.msk.bf16.mxu1 %vm427_vm1, %v1944_v9  ;;  %v1964_v29 = vld [vmem:[#allocation3 + $0xe0] sm:$0xff]   ;;  %v1965_v30 = vld [vmem:[#allocation3 + $0x68] sm:$0xff]  }
  0x2b   :  { %79 = vst.msk [vmem:[#allocation2 + $0xe0] sm:$0xff] %vm50_vm0, %v2044_v0  ;;  %80 = vst.msk [vmem:[#allocation2 + $0xe8] sm:$0xff] %vm50_vm0, %v2044_v0  ;;  %v1966_v31 = vld [vmem:[#allocation3 + $0xe8] sm:$0xff]   ;;  %v1967_v32 = vld [vmem:[#allocation3 + $0x70] sm:$0xff]  }
  0x2c   :  { %81 = vst.msk [vmem:[#allocation2 + $0xf0] sm:$0xff] %vm50_vm0, %v2044_v0  ;;  %82 = vst.msk [vmem:[#allocation2 + $0xf8] sm:$0xff] %vm50_vm0, %v2044_v0  ;;  %v1968_v33 = vld [vmem:[#allocation3 + $0xf0] sm:$0xff]   ;;  %v1969_v34 = vld [vmem:[#allocation3 + $0x78] sm:$0xff]  }
  0x2d   :  { %83 = vst.msk [vmem:[#allocation2 + $0x100] sm:$0xff] %vm50_vm0, %v2044_v0  ;;  %84 = vst.msk [vmem:[#allocation2 + $0x108] sm:$0xff] %vm50_vm0, %v2044_v0  ;;  %v1970_v35 = vld [vmem:[#allocation3 + $0xf8] sm:$0xff]   ;;  %v181_v36 = vld [vmem:[#allocation2 + $0x10] sm:$0xff] }
  0x2e   :  { %85 = vst.msk [vmem:[#allocation2 + $0x110] sm:$0xff] %vm50_vm0, %v2044_v0  ;;  %86 = vst.msk [vmem:[#allocation2 + $0x118] sm:$0xff] %vm50_vm0, %v2044_v0  ;;  %v179_v40 = vld [vmem:[#allocation2] sm:$0xff]  ;;  %v182_v46 = vld [vmem:[#allocation2 + $0x18] sm:$0xff] }
  0x2f   :  { %87 = vst.msk [vmem:[#allocation2 + $0x120] sm:$0xff] %vm50_vm0, %v2044_v0  ;;  %88 = vst.msk [vmem:[#allocation2 + $0x128] sm:$0xff] %vm50_vm0, %v2044_v0  ;;  %v180_v52 = vld [vmem:[#allocation2 + $0x8] sm:$0xff]  ;;  %v185_v58 = vld [vmem:[#allocation2 + $0x30] sm:$0xff] }
  0x30   :  { %89 = vst.msk [vmem:[#allocation2 + $0x130] sm:$0xff] %vm50_vm0, %v2044_v0  ;;  %90 = vst.msk [vmem:[#allocation2 + $0x138] sm:$0xff] %vm50_vm0, %v2044_v0  ;;  %v2257_v62 = vld [vmem:[%s2702_s2] ss:$0 sm:$0xff] }
  0x31   :  { %91 = vst.msk [vmem:[#allocation2 + $0x140] sm:$0xff] %vm50_vm0, %v2044_v0  ;;  %92 = vst.msk [vmem:[#allocation2 + $0x148] sm:$0xff] %vm50_vm0, %v2044_v0  ;;  %1865 = vmatmul.mubr.msk.bf16.gmra.mxu0 %vm427_vm1, %v1945_v10  ;;  %1897 = vmatmul.mubr.msk.bf16.gmra.mxu1 %vm427_vm1, %v1946_v11  ;;  %v183_v1 = vld [vmem:[#allocation2 + $0x20] sm:$0xff] }
  0x32   :  { %93 = vst.msk [vmem:[#allocation2 + $0x150] sm:$0xff] %vm50_vm0, %v2044_v0  ;;  %94 = vst.msk [vmem:[#allocation2 + $0x158] sm:$0xff] %vm50_vm0, %v2044_v0  ;;  %1868 = vmatprep.mubr.msk.bf16.mxu0 %vm427_vm1, %v1947_v12  ;;  %1900 = vmatprep.mubr.msk.bf16.mxu1 %vm427_vm1, %v1948_v13  ;;  %v186_v13 = vld [vmem:[#allocation2 + $0x38] sm:$0xff] }
  0x33   :  { %95 = vst.msk [vmem:[#allocation2 + $0x160] sm:$0xff] %vm50_vm0, %v2044_v0  ;;  %96 = vst.msk [vmem:[#allocation2 + $0x168] sm:$0xff] %vm50_vm0, %v2044_v0 }
  0x34   :  { %97 = vst.msk [vmem:[#allocation2 + $0x170] sm:$0xff] %vm50_vm0, %v2044_v0  ;;  %98 = vst.msk [vmem:[#allocation2 + $0x178] sm:$0xff] %vm50_vm0, %v2044_v0  ;;  %v211_v41 = vld [vmem:[#allocation2 + $0x100] sm:$0xff]  ;;  %v212_v53 = vld [vmem:[#allocation2 + $0x108] sm:$0xff] }
  0x35   :  { %99 = vst.msk [vmem:[#allocation2 + $0x180] sm:$0xff] %vm50_vm0, %v2044_v0  ;;  %100 = vst.msk [vmem:[#allocation2 + $0x188] sm:$0xff] %vm50_vm0, %v2044_v0  ;;  %v213_v37 = vld [vmem:[#allocation2 + $0x110] sm:$0xff]  ;;  %v214_v47 = vld [vmem:[#allocation2 + $0x118] sm:$0xff] }
  0x36   :  { %101 = vst.msk [vmem:[#allocation2 + $0x190] sm:$0xff] %vm50_vm0, %v2044_v0  ;;  %102 = vst.msk [vmem:[#allocation2 + $0x198] sm:$0xff] %vm50_vm0, %v2044_v0  ;;  %v215_v2 = vld [vmem:[#allocation2 + $0x120] sm:$0xff] }
  0x37   :  { %103 = vst.msk [vmem:[#allocation2 + $0x1a0] sm:$0xff] %vm50_vm0, %v2044_v0  ;;  %104 = vst.msk [vmem:[#allocation2 + $0x1a8] sm:$0xff] %vm50_vm0, %v2044_v0  ;;  %v217_v59 = vld [vmem:[#allocation2 + $0x130] sm:$0xff] }
  0x38   :  { %105 = vst.msk [vmem:[#allocation2 + $0x1b0] sm:$0xff] %vm50_vm0, %v2044_v0  ;;  %106 = vst.msk [vmem:[#allocation2 + $0x1b8] sm:$0xff] %vm50_vm0, %v2044_v0 }
  0x39   :  { %107 = vst.msk [vmem:[#allocation2 + $0x1c0] sm:$0xff] %vm50_vm0, %v2044_v0  ;;  %108 = vst.msk [vmem:[#allocation2 + $0x1c8] sm:$0xff] %vm50_vm0, %v2044_v0  ;;  %1869 = vmatmul.mubr.msk.bf16.gmra.mxu0 %vm427_vm1, %v1949_v14  ;;  %1901 = vmatmul.mubr.msk.bf16.gmra.mxu1 %vm427_vm1, %v1950_v15  ;;  %v218_v14 = vld [vmem:[#allocation2 + $0x138] sm:$0xff]  ;;  %v2268_v15 = vld [vmem:[%s2703_s3] ss:$0 sm:$0xff] }
  0x3a   :  { %109 = vst.msk [vmem:[#allocation2 + $0x1d0] sm:$0xff] %vm50_vm0, %v2044_v0  ;;  %110 = vst.msk [vmem:[#allocation2 + $0x1d8] sm:$0xff] %vm50_vm0, %v2044_v0  ;;  %1872 = vmatprep.mubr.msk.bf16.mxu0 %vm427_vm1, %v1951_v16  ;;  %1904 = vmatprep.mubr.msk.bf16.mxu1 %vm427_vm1, %v1952_v17 }
  0x3b   :  { %111 = vst.msk [vmem:[#allocation2 + $0x1e0] sm:$0xff] %vm50_vm0, %v2044_v0  ;;  %112 = vst.msk [vmem:[#allocation2 + $0x1e8] sm:$0xff] %vm50_vm0, %v2044_v0 }
  0x3c   :  { %113 = vst.msk [vmem:[#allocation2 + $0x1f0] sm:$0xff] %vm50_vm0, %v2044_v0  ;;  %114 = vst.msk [vmem:[#allocation2 + $0x1f8] sm:$0xff] %vm50_vm0, %v2044_v0 }
  0x41   :  { %1873 = vmatmul.mubr.msk.bf16.gmra.mxu0 %vm427_vm1, %v1953_v18  ;;  %1905 = vmatmul.mubr.msk.bf16.gmra.mxu1 %vm427_vm1, %v1954_v19 }
  0x42   :  { %1876 = vmatprep.mubr.msk.bf16.mxu0 %vm427_vm1, %v1955_v20  ;;  %1908 = vmatprep.mubr.msk.bf16.mxu1 %vm427_vm1, %v1956_v21 }
  0x49   :  { %1877 = vmatmul.mubr.msk.bf16.gmra.mxu0 %vm427_vm1, %v1957_v22  ;;  %1909 = vmatmul.mubr.msk.bf16.gmra.mxu1 %vm427_vm1, %v1958_v23 }
  0x4a   :  { %1880 = vmatprep.mubr.msk.bf16.mxu0 %vm427_vm1, %v1959_v24  ;;  %1912 = vmatprep.mubr.msk.bf16.mxu1 %vm427_vm1, %v1960_v25  ;;  %v184_v24 = vld [vmem:[#allocation2 + $0x28] sm:$0xff] }
  0x4b   :  { %v216_v25 = vld [vmem:[#allocation2 + $0x128] sm:$0xff] }
  0x51   :  { %1881 = vmatmul.mubr.msk.bf16.gmra.mxu0 %vm427_vm1, %v1961_v26  ;;  %1913 = vmatmul.mubr.msk.bf16.gmra.mxu1 %vm427_vm1, %v1962_v27  ;;  %v2277_v26 = vld [vmem:[%s2704_s4] ss:$0 sm:$0xff] }
  0x52   :  { %1884 = vmatprep.mubr.msk.bf16.mxu0 %vm427_vm1, %v1963_v28  ;;  %1916 = vmatprep.mubr.msk.bf16.mxu1 %vm427_vm1, %v1964_v29 }
  0x59   :  { %1885 = vmatmul.mubr.msk.bf16.gmra.mxu0 %vm427_vm1, %v1965_v30  ;;  %1917 = vmatmul.mubr.msk.bf16.gmra.mxu1 %vm427_vm1, %v1966_v31 }
  0x5a   :  { %1888 = vmatprep.mubr.msk.bf16.mxu0 %vm427_vm1, %v1967_v32  ;;  %1920 = vmatprep.mubr.msk.bf16.mxu1 %vm427_vm1, %v1968_v33 }
  0x61   :  { %1889 = vmatmul.mubr.msk.bf16.gmra.mxu0 %vm427_vm1, %v1969_v34  ;;  %1921 = vmatmul.mubr.msk.bf16.gmra.mxu1 %vm427_vm1, %v1970_v35 }
  0xe9   :  { %v1862_v38 = vpop.f32.mrf.mxu0  ;;  %v1894_v39 = vpop.f32.mrf.mxu1 }
  0xea   :  { %v815_v42 = vadd.f32 %v1862_v38, %v181_v36  ;;  %v847_v43 = vadd.f32 %v1894_v39, %v213_v37 }
  0xeb   :  { %v558_v44 = vpop.f32.mrf.mxu0  ;;  %v686_v45 = vpop.f32.mrf.mxu1 }
  0xec   :  { %879 = vst.msk [vmem:[#allocation2 + $0x10] sm:$0xff] %vm50_vm0, %v815_v42  ;;  %911 = vst.msk [vmem:[#allocation2 + $0x110] sm:$0xff] %vm50_vm0, %v847_v43  ;;  %v813_v48 = vadd.f32 %v558_v44, %v179_v40  ;;  %v845_v49 = vadd.f32 %v686_v45, %v211_v41 }
  0xed   :  { %v1863_v50 = vpop.f32.mrf.mxu0  ;;  %v1895_v51 = vpop.f32.mrf.mxu1 }
  0xee   :  { %877 = vst.msk [vmem:[#allocation2] sm:$0xff] %vm50_vm0, %v813_v48  ;;  %909 = vst.msk [vmem:[#allocation2 + $0x100] sm:$0xff] %vm50_vm0, %v845_v49  ;;  %v816_v54 = vadd.f32 %v1863_v50, %v182_v46  ;;  %v848_v55 = vadd.f32 %v1895_v51, %v214_v47 }
  0xef   :  { %v561_v56 = vpop.f32.mrf.mxu0  ;;  %v689_v57 = vpop.f32.mrf.mxu1 }
  0xf0   :  { %880 = vst.msk [vmem:[#allocation2 + $0x18] sm:$0xff] %vm50_vm0, %v816_v54  ;;  %912 = vst.msk [vmem:[#allocation2 + $0x118] sm:$0xff] %vm50_vm0, %v848_v55  ;;  %v814_v60 = vadd.f32 %v561_v56, %v180_v52  ;;  %v846_v61 = vadd.f32 %v689_v57, %v212_v53 }
  0xf1   :  { %v1866_v63 = vpop.f32.mrf.mxu0  ;;  %v1898_v0 = vpop.f32.mrf.mxu1 }
  0xf2   :  { %878 = vst.msk [vmem:[#allocation2 + $0x8] sm:$0xff] %vm50_vm0, %v814_v60  ;;  %910 = vst.msk [vmem:[#allocation2 + $0x108] sm:$0xff] %vm50_vm0, %v846_v61  ;;  %v819_v3 = vadd.f32 %v1866_v63, %v185_v58  ;;  %v851_v4 = vadd.f32 %v1898_v0, %v217_v59 }
  0xf3   :  { %v943_v5 = vld [vmem:[#allocation2 + $0x10] sm:$0xff]  ;;  %v574_v7 = vpop.f32.mrf.mxu0  ;;  %v702_v8 = vpop.f32.mrf.mxu1 }
  0xf4   :  { %v975_v6 = vld [vmem:[#allocation2 + $0x110] sm:$0xff]  ;;  %v1014_v9 = vadd.f32 %v2257_v62, %v943_v5  ;;  %883 = vst.msk [vmem:[#allocation2 + $0x30] sm:$0xff] %vm50_vm0, %v819_v3  ;;  %915 = vst.msk [vmem:[#allocation2 + $0x130] sm:$0xff] %vm50_vm0, %v851_v4  ;;  %v817_v11 = vadd.f32 %v574_v7, %v183_v1  ;;  %v849_v12 = vadd.f32 %v702_v8, %v215_v2 }
  0xf5   :  { %v1046_v10 = vadd.f32 %v2257_v62, %v975_v6  ;;  %v941_v16 = vld [vmem:[#allocation2] sm:$0xff]  ;;  %v1867_v18 = vpop.f32.mrf.mxu0  ;;  %v1899_v19 = vpop.f32.mrf.mxu1 }
  0xf6   :  { %v973_v17 = vld [vmem:[#allocation2 + $0x100] sm:$0xff]  ;;  %v1078_v20 = vmax.f32 %v1014_v9, 0.0  ;;  %v1012_v22 = vadd.f32 %v2257_v62, %v941_v16  ;;  %881 = vst.msk [vmem:[#allocation2 + $0x20] sm:$0xff] %vm50_vm0, %v817_v11  ;;  %913 = vst.msk [vmem:[#allocation2 + $0x120] sm:$0xff] %vm50_vm0, %v849_v12  ;;  %v820_v29 = vadd.f32 %v1867_v18, %v186_v13  ;;  %v852_v30 = vadd.f32 %v1899_v19, %v218_v14 }
  0xf7   :  { %v1110_v21 = vmax.f32 %v1046_v10, 0.0  ;;  %v1044_v23 = vadd.f32 %v2257_v62, %v973_v17  ;;  %v944_v27 = vld [vmem:[#allocation2 + $0x18] sm:$0xff]  ;;  %v577_v31 = vpop.f32.mrf.mxu0  ;;  %v705_v32 = vpop.f32.mrf.mxu1 }
  0xf8   :  { %v976_v28 = vld [vmem:[#allocation2 + $0x118] sm:$0xff]  ;;  %v1149_v33 = vmul.f32 %v2268_v15, %v1078_v20  ;;  %v1076_v35 = vmax.f32 %v1012_v22, 0.0  ;;  %v1015_v37 = vadd.f32 %v2257_v62, %v944_v27  ;;  %884 = vst.msk [vmem:[#allocation2 + $0x38] sm:$0xff] %vm50_vm0, %v820_v29  ;;  %916 = vst.msk [vmem:[#allocation2 + $0x138] sm:$0xff] %vm50_vm0, %v852_v30  ;;  %v818_v41 = vadd.f32 %v577_v31, %v184_v24 }
  0xf9   :  { %v1181_v34 = vmul.f32 %v2268_v15, %v1110_v21  ;;  %v1108_v36 = vmax.f32 %v1044_v23, 0.0  ;;  %v1047_v38 = vadd.f32 %v2257_v62, %v976_v28  ;;  %v942_v39 = vld [vmem:[#allocation2 + $0x8] sm:$0xff]  ;;  %v850_v42 = vadd.f32 %v705_v32, %v216_v25  ;;  %v2285_v43 = vpop.f32.mrf.mxu0  ;;  %v2287_v44 = vpop.f32.mrf.mxu1 }
  0xfa   :  { %v974_v40 = vld [vmem:[#allocation2 + $0x108] sm:$0xff]  ;;  %v1220_v45 = vadd.f32 %v2277_v26, %v1149_v33  ;;  %v1147_v47 = vmul.f32 %v2268_v15, %v1076_v35  ;;  %v1079_v49 = vmax.f32 %v1015_v37, 0.0  ;;  %v1013_v51 = vadd.f32 %v2257_v62, %v942_v39  ;;  %882 = vst.msk [vmem:[#allocation2 + $0x28] sm:$0xff] %vm50_vm0, %v818_v41 }
  0xfb   :  { %v1252_v46 = vadd.f32 %v2277_v26, %v1181_v34  ;;  %v1179_v48 = vmul.f32 %v2268_v15, %v1108_v36  ;;  %v1111_v50 = vmax.f32 %v1047_v38, 0.0  ;;  %v1045_v52 = vadd.f32 %v2257_v62, %v974_v40  ;;  %v947_v53 = vld [vmem:[#allocation2 + $0x30] sm:$0xff]  ;;  %914 = vst.msk [vmem:[#allocation2 + $0x128] sm:$0xff] %vm50_vm0, %v850_v42  ;;  %v2297_v55 = vpop.f32.mrf.mxu0  ;;  %v2299_v56 = vpop.f32.mrf.mxu1 }
  0xfc   :  { %v979_v54 = vld [vmem:[#allocation2 + $0x130] sm:$0xff]  ;;  %v1757_v57 = vpack.c.bf16 %v1220_v45, %v1220_v45  ;;  %v1218_v59 = vadd.f32 %v2277_v26, %v1147_v47  ;;  %v1150_v61 = vmul.f32 %v2268_v15, %v1079_v49  ;;  %v1077_v0 = vmax.f32 %v1013_v51, 0.0 }
  0xfd   :  { %v1789_v58 = vpack.c.bf16 %v1252_v46, %v1252_v46  ;;  %v1250_v60 = vadd.f32 %v2277_v26, %v1179_v48  ;;  %v1182_v63 = vmul.f32 %v2268_v15, %v1111_v50  ;;  %v1109_v1 = vmax.f32 %v1045_v52, 0.0  ;;  %v945_v2 = vld [vmem:[#allocation2 + $0x20] sm:$0xff]  ;;  %v2305_v4 = vpop.f32.mrf.mxu0  ;;  %v2307_v5 = vpop.f32.mrf.mxu1  ;;  %v189_v52 = vld [vmem:[#allocation2 + $0x50] sm:$0xff] }
  0xfe   :  { %v977_v3 = vld [vmem:[#allocation2 + $0x120] sm:$0xff]  ;;  %1541 = vst.msk [vmem:[#allocation8 + $0x8] sm:$0xf] %vm1538_vm2, %v1757_v57  ;;  %v1755_v6 = vpack.c.bf16 %v1218_v59, %v1218_v59  ;;  %v1018_v8 = vadd.f32 %v2257_v62, %v947_v53  ;;  %v1050_v9 = vadd.f32 %v2257_v62, %v979_v54  ;;  %v1221_v10 = vadd.f32 %v2277_v26, %v1150_v61  ;;  %v221_v53 = vld [vmem:[#allocation2 + $0x150] sm:$0xff] }
  0xff   :  { %1573 = vst.msk [vmem:[#allocation8 + $0x88] sm:$0xf] %vm1538_vm2, %v1789_v58  ;;  %v1787_v7 = vpack.c.bf16 %v1250_v60, %v1250_v60  ;;  %v1253_v11 = vadd.f32 %v2277_v26, %v1182_v63  ;;  %v1148_v12 = vmul.f32 %v2268_v15, %v1077_v0  ;;  %v1180_v13 = vmul.f32 %v2268_v15, %v1109_v1  ;;  %v2317_v14 = vpop.f32.mrf.mxu0  ;;  %v2319_v16 = vpop.f32.mrf.mxu1  ;;  %v948_v21 = vld [vmem:[#allocation2 + $0x38] sm:$0xff]  ;;  %v187_v63 = vld [vmem:[#allocation2 + $0x40] sm:$0xff] }
 0x100   :  { %1539 = vst.msk [vmem:[#allocation8] sm:$0xf] %vm1538_vm2, %v1755_v6  ;;  %v1082_v17 = vmax.f32 %v1018_v8, 0.0  ;;  %v1114_v18 = vmax.f32 %v1050_v9, 0.0  ;;  %v1016_v19 = vadd.f32 %v2257_v62, %v945_v2  ;;  %v1048_v20 = vadd.f32 %v2257_v62, %v977_v3  ;;  %v980_v22 = vld [vmem:[#allocation2 + $0x138] sm:$0xff]  ;;  %v219_v6 = vld [vmem:[#allocation2 + $0x140] sm:$0xff] }
 0x101   :  { %1571 = vst.msk [vmem:[#allocation8 + $0x80] sm:$0xf] %vm1538_vm2, %v1787_v7  ;;  %v1758_v23 = vpack.c.bf16 %v1221_v10, %v1221_v10  ;;  %v1790_v24 = vpack.c.bf16 %v1253_v11, %v1253_v11  ;;  %v1219_v25 = vadd.f32 %v2277_v26, %v1148_v12  ;;  %v1251_v27 = vadd.f32 %v2277_v26, %v1180_v13  ;;  %v2327_v28 = vpop.f32.mrf.mxu0  ;;  %v2329_v29 = vpop.f32.mrf.mxu1  ;;  %v946_v34 = vld [vmem:[#allocation2 + $0x28] sm:$0xff]  ;;  %v190_v7 = vld [vmem:[#allocation2 + $0x58] sm:$0xff] }
 0x102   :  { %v1153_v30 = vmul.f32 %v2268_v15, %v1082_v17  ;;  %v1185_v31 = vmul.f32 %v2268_v15, %v1114_v18  ;;  %v1080_v32 = vmax.f32 %v1016_v19, 0.0  ;;  %v1112_v33 = vmax.f32 %v1048_v20, 0.0  ;;  %v978_v35 = vld [vmem:[#allocation2 + $0x128] sm:$0xff]  ;;  %v222_v8 = vld [vmem:[#allocation2 + $0x158] sm:$0xff]  ;;  %v193_v20 = vld [vmem:[#allocation2 + $0x70] sm:$0xff] }
 0x103   :  { %1542 = vst.msk [vmem:[#allocation8 + $0xc] sm:$0xf] %vm1538_vm2, %v1758_v23  ;;  %1574 = vst.msk [vmem:[#allocation8 + $0x8c] sm:$0xf] %vm1538_vm2, %v1790_v24  ;;  %v1756_v36 = vpack.c.bf16 %v1219_v25, %v1219_v25  ;;  %v1788_v37 = vpack.c.bf16 %v1251_v27, %v1251_v27  ;;  %v1019_v38 = vadd.f32 %v2257_v62, %v948_v21  ;;  %v2337_v40 = vpop.f32.mrf.mxu0  ;;  %v2339_v41 = vpop.f32.mrf.mxu1  ;;  %v188_v18 = vld [vmem:[#allocation2 + $0x48] sm:$0xff]  ;;  %v225_v25 = vld [vmem:[#allocation2 + $0x170] sm:$0xff] }
 0x104   :  { %v1051_v39 = vadd.f32 %v2257_v62, %v980_v22  ;;  %v1224_v42 = vadd.f32 %v2277_v26, %v1153_v30  ;;  %v1256_v45 = vadd.f32 %v2277_v26, %v1185_v31  ;;  %v1151_v46 = vmul.f32 %v2268_v15, %v1080_v32  ;;  %v220_v19 = vld [vmem:[#allocation2 + $0x148] sm:$0xff]  ;;  %v191_v27 = vld [vmem:[#allocation2 + $0x60] sm:$0xff] }
 0x105   :  { %v1183_v47 = vmul.f32 %v2268_v15, %v1112_v33  ;;  %1540 = vst.msk [vmem:[#allocation8 + $0x4] sm:$0xf] %vm1538_vm2, %v1756_v36  ;;  %1572 = vst.msk [vmem:[#allocation8 + $0x84] sm:$0xf] %vm1538_vm2, %v1788_v37  ;;  %v1083_v48 = vmax.f32 %v1019_v38, 0.0  ;;  %v1017_v50 = vadd.f32 %v2257_v62, %v946_v34  ;;  %v1049_v51 = vadd.f32 %v2257_v62, %v978_v35  ;;  %v2349_v54 = vpop.f32.mrf.mxu0  ;;  %v2351_v57 = vpop.f32.mrf.mxu1  ;;  %v223_v30 = vld [vmem:[#allocation2 + $0x160] sm:$0xff] }
 0x106   :  { %v1115_v49 = vmax.f32 %v1051_v39, 0.0  ;;  %v1761_v58 = vpack.c.bf16 %v1224_v42, %v1224_v42  ;;  %v1793_v59 = vpack.c.bf16 %v1256_v45, %v1256_v45  ;;  %v1222_v60 = vadd.f32 %v2277_v26, %v1151_v46  ;;  %v194_v35 = vld [vmem:[#allocation2 + $0x78] sm:$0xff]  ;;  %v192_v37 = vld [vmem:[#allocation2 + $0x68] sm:$0xff] }
 0x107   :  { %v1254_v61 = vadd.f32 %v2277_v26, %v1183_v47  ;;  %v1154_v0 = vmul.f32 %v2268_v15, %v1083_v48  ;;  %v1081_v2 = vmax.f32 %v1017_v50, 0.0  ;;  %v1113_v3 = vmax.f32 %v1049_v51, 0.0  ;;  %v2357_v9 = vpop.f32.mrf.mxu0  ;;  %v2359_v10 = vpop.f32.mrf.mxu1  ;;  %v226_v36 = vld [vmem:[#allocation2 + $0x178] sm:$0xff]  ;;  %v224_v46 = vld [vmem:[#allocation2 + $0x168] sm:$0xff]  ;;  %v197_v47 = vld [vmem:[#allocation2 + $0x90] sm:$0xff] }
 0x108   :  { %v1186_v1 = vmul.f32 %v2268_v15, %v1115_v49  ;;  %1545 = vst.msk [vmem:[#allocation8 + $0x18] sm:$0xf] %vm1538_vm2, %v1761_v58  ;;  %1577 = vst.msk [vmem:[#allocation8 + $0x98] sm:$0xf] %vm1538_vm2, %v1793_v59  ;;  %v1759_v11 = vpack.c.bf16 %v1222_v60, %v1222_v60  ;;  %v823_v13 = vadd.f32 %v2285_v43, %v189_v52  ;;  %v229_v48 = vld [vmem:[#allocation2 + $0x190] sm:$0xff]  ;;  %v195_v51 = vld [vmem:[#allocation2 + $0x80] sm:$0xff] }
 0x109   :  { %v1791_v12 = vpack.c.bf16 %v1254_v61, %v1254_v61  ;;  %v855_v17 = vadd.f32 %v2287_v44, %v221_v53  ;;  %v1225_v21 = vadd.f32 %v2277_v26, %v1154_v0  ;;  %v1152_v23 = vmul.f32 %v2268_v15, %v1081_v2  ;;  %v1878_v31 = vpop.f32.mrf.mxu0  ;;  %v1910_v32 = vpop.f32.mrf.mxu1  ;;  %v227_v52 = vld [vmem:[#allocation2 + $0x180] sm:$0xff]  ;;  %v198_v53 = vld [vmem:[#allocation2 + $0x98] sm:$0xff]  ;;  %v196_v0 = vld [vmem:[#allocation2 + $0x88] sm:$0xff] }
 0x10a   :  { %v1257_v22 = vadd.f32 %v2277_v26, %v1186_v1  ;;  %v1184_v24 = vmul.f32 %v2268_v15, %v1113_v3  ;;  %1543 = vst.msk [vmem:[#allocation8 + $0x10] sm:$0xf] %vm1538_vm2, %v1759_v11  ;;  %v821_v43 = vadd.f32 %v2297_v55, %v187_v63  ;;  %v853_v44 = vadd.f32 %v2299_v56, %v219_v6  ;;  %v230_v63 = vld [vmem:[#allocation2 + $0x198] sm:$0xff]  ;;  %v201_v11 = vld [vmem:[#allocation2 + $0xb0] sm:$0xff] }
 0x10b   :  { %1575 = vst.msk [vmem:[#allocation8 + $0x90] sm:$0xf] %vm1538_vm2, %v1791_v12  ;;  %v824_v33 = vadd.f32 %v2305_v4, %v190_v7  ;;  %v856_v34 = vadd.f32 %v2307_v5, %v222_v8  ;;  %v1762_v38 = vpack.c.bf16 %v1225_v21, %v1225_v21  ;;  %v1223_v42 = vadd.f32 %v2277_v26, %v1152_v23  ;;  %v622_v49 = vpop.f32.mrf.mxu0  ;;  %v750_v55 = vpop.f32.mrf.mxu1 }
 0x10c   :  { %887 = vst.msk [vmem:[#allocation2 + $0x50] sm:$0xff] %vm50_vm0, %v823_v13  ;;  %919 = vst.msk [vmem:[#allocation2 + $0x150] sm:$0xff] %vm50_vm0, %v855_v17  ;;  %v1794_v39 = vpack.c.bf16 %v1257_v22, %v1257_v22  ;;  %v1255_v45 = vadd.f32 %v2277_v26, %v1184_v24  ;;  %v822_v56 = vadd.f32 %v2317_v14, %v188_v18 }
 0x10d   :  { %885 = vst.msk [vmem:[#allocation2 + $0x40] sm:$0xff] %vm50_vm0, %v821_v43  ;;  %917 = vst.msk [vmem:[#allocation2 + $0x140] sm:$0xff] %vm50_vm0, %v853_v44  ;;  %v854_v4 = vadd.f32 %v2319_v16, %v220_v19  ;;  %v827_v5 = vadd.f32 %v2327_v28, %v193_v20  ;;  %v859_v50 = vadd.f32 %v2329_v29, %v225_v25  ;;  %v1879_v14 = vpop.f32.mrf.mxu0  ;;  %v1911_v16 = vpop.f32.mrf.mxu1  ;;  %v228_v28 = vld [vmem:[#allocation2 + $0x188] sm:$0xff]  ;;  %v199_v25 = vld [vmem:[#allocation2 + $0xa0] sm:$0xff] }
 0x10e   :  { %888 = vst.msk [vmem:[#allocation2 + $0x58] sm:$0xff] %vm50_vm0, %v824_v33  ;;  %920 = vst.msk [vmem:[#allocation2 + $0x158] sm:$0xff] %vm50_vm0, %v856_v34  ;;  %v1760_v58 = vpack.c.bf16 %v1223_v42, %v1223_v42  ;;  %v1792_v59 = vpack.c.bf16 %v1255_v45, %v1255_v45  ;;  %v825_v60 = vadd.f32 %v2337_v40, %v191_v27  ;;  %v231_v27 = vld [vmem:[#allocation2 + $0x1a0] sm:$0xff] }
 0x10f   :  { %1546 = vst.msk [vmem:[#allocation8 + $0x1c] sm:$0xf] %vm1538_vm2, %v1762_v38  ;;  %1578 = vst.msk [vmem:[#allocation8 + $0x9c] sm:$0xf] %vm1538_vm2, %v1794_v39  ;;  %v857_v61 = vadd.f32 %v2339_v41, %v223_v30  ;;  %v828_v29 = vadd.f32 %v2349_v54, %v194_v35  ;;  %v860_v1 = vadd.f32 %v2351_v57, %v226_v36  ;;  %v625_v8 = vpop.f32.mrf.mxu0  ;;  %v753_v54 = vpop.f32.mrf.mxu1  ;;  %v233_v57 = vld [vmem:[#allocation2 + $0x1b0] sm:$0xff] }
 0x110   :  { %886 = vst.msk [vmem:[#allocation2 + $0x48] sm:$0xff] %vm50_vm0, %v822_v56  ;;  %918 = vst.msk [vmem:[#allocation2 + $0x148] sm:$0xff] %vm50_vm0, %v854_v4  ;;  %v826_v40 = vadd.f32 %v2357_v9, %v192_v37  ;;  %v858_v41 = vadd.f32 %v2359_v10, %v224_v46  ;;  %v831_v2 = vadd.f32 %v1878_v31, %v197_v47 }
 0x111   :  { %891 = vst.msk [vmem:[#allocation2 + $0x70] sm:$0xff] %vm50_vm0, %v827_v5  ;;  %923 = vst.msk [vmem:[#allocation2 + $0x170] sm:$0xff] %vm50_vm0, %v859_v50  ;;  %v863_v3 = vadd.f32 %v1910_v32, %v229_v48  ;;  %v829_v6 = vadd.f32 %v622_v49, %v195_v51  ;;  %v861_v7 = vadd.f32 %v750_v55, %v227_v52  ;;  %v1882_v19 = vpop.f32.mrf.mxu0  ;;  %v1914_v20 = vpop.f32.mrf.mxu1 }
 0x112   :  { %1544 = vst.msk [vmem:[#allocation8 + $0x14] sm:$0xf] %vm1538_vm2, %v1760_v58  ;;  %1576 = vst.msk [vmem:[#allocation8 + $0x94] sm:$0xf] %vm1538_vm2, %v1792_v59  ;;  %v832_v9 = vadd.f32 %v1879_v14, %v198_v53  ;;  %v864_v10 = vadd.f32 %v1911_v16, %v230_v63  ;;  %v830_v12 = vadd.f32 %v625_v8, %v196_v0 }
 0x113   :  { %889 = vst.msk [vmem:[#allocation2 + $0x60] sm:$0xff] %vm50_vm0, %v825_v60  ;;  %921 = vst.msk [vmem:[#allocation2 + $0x160] sm:$0xff] %vm50_vm0, %v857_v61  ;;  %v862_v13 = vadd.f32 %v753_v54, %v228_v28  ;;  %v951_v17 = vld [vmem:[#allocation2 + $0x50] sm:$0xff]  ;;  %v835_v23 = vadd.f32 %v1882_v19, %v201_v11  ;;  %v867_v24 = vadd.f32 %v1914_v20, %v233_v57  ;;  %v638_v43 = vpop.f32.mrf.mxu0  ;;  %v766_v44 = vpop.f32.mrf.mxu1 }
 0x114   :  { %892 = vst.msk [vmem:[#allocation2 + $0x78] sm:$0xff] %vm50_vm0, %v828_v29  ;;  %924 = vst.msk [vmem:[#allocation2 + $0x178] sm:$0xff] %vm50_vm0, %v860_v1  ;;  %v983_v18 = vld [vmem:[#allocation2 + $0x150] sm:$0xff]  ;;  %v1022_v21 = vadd.f32 %v2257_v62, %v951_v17  ;;  %v949_v30 = vld [vmem:[#allocation2 + $0x40] sm:$0xff]  ;;  %v833_v46 = vadd.f32 %v638_v43, %v199_v25  ;;  %v865_v47 = vadd.f32 %v766_v44, %v231_v27 }
 0x115   :  { %890 = vst.msk [vmem:[#allocation2 + $0x68] sm:$0xff] %vm50_vm0, %v826_v40  ;;  %922 = vst.msk [vmem:[#allocation2 + $0x168] sm:$0xff] %vm50_vm0, %v858_v41  ;;  %v1054_v22 = vadd.f32 %v2257_v62, %v983_v18  ;;  %v981_v31 = vld [vmem:[#allocation2 + $0x140] sm:$0xff]  ;;  %v952_v32 = vld [vmem:[#allocation2 + $0x58] sm:$0xff]  ;;  %v1020_v35 = vadd.f32 %v2257_v62, %v949_v30  ;;  %v2423_v48 = vpop.f32.mrf.mxu0  ;;  %v2425_v49 = vpop.f32.mrf.mxu1 }
 0x116   :  { %895 = vst.msk [vmem:[#allocation2 + $0x90] sm:$0xff] %vm50_vm0, %v831_v2  ;;  %927 = vst.msk [vmem:[#allocation2 + $0x190] sm:$0xff] %vm50_vm0, %v863_v3  ;;  %v1086_v33 = vmax.f32 %v1022_v21, 0.0  ;;  %v1052_v36 = vadd.f32 %v2257_v62, %v981_v31  ;;  %v984_v37 = vld [vmem:[#allocation2 + $0x158] sm:$0xff]  ;;  %v1023_v38 = vadd.f32 %v2257_v62, %v952_v32 }
 0x117   :  { %893 = vst.msk [vmem:[#allocation2 + $0x80] sm:$0xff] %vm50_vm0, %v829_v6  ;;  %925 = vst.msk [vmem:[#allocation2 + $0x180] sm:$0xff] %vm50_vm0, %v861_v7  ;;  %v1118_v34 = vmax.f32 %v1054_v22, 0.0  ;;  %v1055_v39 = vadd.f32 %v2257_v62, %v984_v37  ;;  %v950_v42 = vld [vmem:[#allocation2 + $0x48] sm:$0xff]  ;;  %v1084_v4 = vmax.f32 %v1020_v35, 0.0  ;;  %v2437_v14 = vpop.f32.mrf.mxu0  ;;  %v2439_v63 = vpop.f32.mrf.mxu1 }
 0x118   :  { %896 = vst.msk [vmem:[#allocation2 + $0x98] sm:$0xff] %vm50_vm0, %v832_v9  ;;  %928 = vst.msk [vmem:[#allocation2 + $0x198] sm:$0xff] %vm50_vm0, %v864_v10  ;;  %v982_v45 = vld [vmem:[#allocation2 + $0x148] sm:$0xff]  ;;  %v1157_v55 = vmul.f32 %v2268_v15, %v1086_v33  ;;  %v1116_v5 = vmax.f32 %v1052_v36, 0.0  ;;  %v1087_v50 = vmax.f32 %v1023_v38, 0.0  ;;  %v1021_v52 = vadd.f32 %v2257_v62, %v950_v42  ;;  %v955_v1 = vld [vmem:[#allocation2 + $0x70] sm:$0xff] }
 0x119   :  { %894 = vst.msk [vmem:[#allocation2 + $0x88] sm:$0xff] %vm50_vm0, %v830_v12  ;;  %926 = vst.msk [vmem:[#allocation2 + $0x188] sm:$0xff] %vm50_vm0, %v862_v13  ;;  %v1189_v56 = vmul.f32 %v2268_v15, %v1118_v34  ;;  %v1119_v51 = vmax.f32 %v1055_v39, 0.0  ;;  %v1053_v53 = vadd.f32 %v2257_v62, %v982_v45  ;;  %v1155_v60 = vmul.f32 %v2268_v15, %v1084_v4  ;;  %v987_v40 = vld [vmem:[#allocation2 + $0x170] sm:$0xff]  ;;  %v2453_v20 = vpop.f32.mrf.mxu0  ;;  %v2455_v21 = vpop.f32.mrf.mxu1 }
 0x11a   :  { %899 = vst.msk [vmem:[#allocation2 + $0xb0] sm:$0xff] %vm50_vm0, %v835_v23  ;;  %931 = vst.msk [vmem:[#allocation2 + $0x1b0] sm:$0xff] %vm50_vm0, %v867_v24  ;;  %v1228_v58 = vadd.f32 %v2277_v26, %v1157_v55  ;;  %v1187_v61 = vmul.f32 %v2268_v15, %v1116_v5  ;;  %v1158_v16 = vmul.f32 %v2268_v15, %v1087_v50  ;;  %v1085_v28 = vmax.f32 %v1021_v52, 0.0  ;;  %v953_v57 = vld [vmem:[#allocation2 + $0x60] sm:$0xff] }
 0x11b   :  { %897 = vst.msk [vmem:[#allocation2 + $0xa0] sm:$0xff] %vm50_vm0, %v833_v46  ;;  %929 = vst.msk [vmem:[#allocation2 + $0x1a0] sm:$0xff] %vm50_vm0, %v865_v47  ;;  %v1260_v59 = vadd.f32 %v2277_v26, %v1189_v56  ;;  %v1190_v0 = vmul.f32 %v2268_v15, %v1119_v51  ;;  %v1117_v29 = vmax.f32 %v1053_v53, 0.0  ;;  %v1226_v3 = vadd.f32 %v2277_v26, %v1155_v60  ;;  %v985_v9 = vld [vmem:[#allocation2 + $0x160] sm:$0xff]  ;;  %v956_v18 = vld [vmem:[#allocation2 + $0x78] sm:$0xff]  ;;  %v2469_v45 = vpop.f32.mrf.mxu0  ;;  %v2471_v46 = vpop.f32.mrf.mxu1 }
 0x11c   :  { %v1765_v41 = vpack.c.bf16 %v1228_v58, %v1228_v58  ;;  %v1258_v6 = vadd.f32 %v2277_v26, %v1187_v61  ;;  %v1229_v7 = vadd.f32 %v2277_v26, %v1158_v16  ;;  %v1156_v54 = vmul.f32 %v2268_v15, %v1085_v28  ;;  %v988_v19 = vld [vmem:[#allocation2 + $0x178] sm:$0xff]  ;;  %v954_v43 = vld [vmem:[#allocation2 + $0x68] sm:$0xff] }
 0x11d   :  { %v1797_v2 = vpack.c.bf16 %v1260_v59, %v1260_v59  ;;  %v1261_v8 = vadd.f32 %v2277_v26, %v1190_v0  ;;  %v1188_v11 = vmul.f32 %v2268_v15, %v1117_v29  ;;  %v1763_v10 = vpack.c.bf16 %v1226_v3, %v1226_v3  ;;  %v986_v44 = vld [vmem:[#allocation2 + $0x168] sm:$0xff]  ;;  %v959_v61 = vld [vmem:[#allocation2 + $0x90] sm:$0xff] }
 0x11e   :  { %1549 = vst.msk [vmem:[#allocation8 + $0x28] sm:$0xf] %vm1538_vm2, %v1765_v41  ;;  %v1795_v12 = vpack.c.bf16 %v1258_v6, %v1258_v6  ;;  %v1026_v13 = vadd.f32 %v2257_v62, %v955_v1  ;;  %v1058_v17 = vadd.f32 %v2257_v62, %v987_v40  ;;  %v1766_v22 = vpack.c.bf16 %v1229_v7, %v1229_v7  ;;  %v991_v16 = vld [vmem:[#allocation2 + $0x190] sm:$0xff]  ;;  %v2485_v40 = vpop.f32.mrf.mxu0  ;;  %v2487_v41 = vpop.f32.mrf.mxu1 }
 0x11f   :  { %1581 = vst.msk [vmem:[#allocation8 + $0xa8] sm:$0xf] %vm1538_vm2, %v1797_v2  ;;  %v1798_v23 = vpack.c.bf16 %v1261_v8, %v1261_v8  ;;  %v1227_v24 = vadd.f32 %v2277_v26, %v1156_v54  ;;  %v1259_v25 = vadd.f32 %v2277_v26, %v1188_v11  ;;  %1547 = vst.msk [vmem:[#allocation8 + $0x20] sm:$0xf] %vm1538_vm2, %v1763_v10  ;;  %v957_v8 = vld [vmem:[#allocation2 + $0x80] sm:$0xff] }
 0x120   :  { %1579 = vst.msk [vmem:[#allocation8 + $0xa0] sm:$0xf] %vm1538_vm2, %v1795_v12  ;;  %v1090_v27 = vmax.f32 %v1026_v13, 0.0  ;;  %v1122_v30 = vmax.f32 %v1058_v17, 0.0  ;;  %v1024_v31 = vadd.f32 %v2257_v62, %v953_v57  ;;  %v1056_v32 = vadd.f32 %v2257_v62, %v985_v9  ;;  %1550 = vst.msk [vmem:[#allocation8 + $0x2c] sm:$0xf] %vm1538_vm2, %v1766_v22 }
 0x121   :  { %1582 = vst.msk [vmem:[#allocation8 + $0xac] sm:$0xf] %vm1538_vm2, %v1798_v23  ;;  %v1764_v33 = vpack.c.bf16 %v1227_v24, %v1227_v24  ;;  %v1796_v34 = vpack.c.bf16 %v1259_v25, %v1259_v25  ;;  %v1027_v35 = vadd.f32 %v2257_v62, %v956_v18  ;;  %v1059_v36 = vadd.f32 %v2257_v62, %v988_v19  ;;  %v989_v54 = vld [vmem:[#allocation2 + $0x180] sm:$0xff]  ;;  %v960_v12 = vld [vmem:[#allocation2 + $0x98] sm:$0xff] }
 0x122   :  { %v1161_v37 = vmul.f32 %v2268_v15, %v1090_v27  ;;  %v1193_v38 = vmul.f32 %v2268_v15, %v1122_v30  ;;  %v1088_v39 = vmax.f32 %v1024_v31, 0.0  ;;  %v1120_v42 = vmax.f32 %v1056_v32, 0.0  ;;  %v992_v13 = vld [vmem:[#allocation2 + $0x198] sm:$0xff]  ;;  %v958_v30 = vld [vmem:[#allocation2 + $0x88] sm:$0xff]  ;;  %v2503_v32 = vpop.f32.mrf.mxu0 }
 0x123   :  { %1548 = vst.msk [vmem:[#allocation8 + $0x24] sm:$0xf] %vm1538_vm2, %v1764_v33  ;;  %1580 = vst.msk [vmem:[#allocation8 + $0xa4] sm:$0xf] %vm1538_vm2, %v1796_v34  ;;  %v1091_v47 = vmax.f32 %v1027_v35, 0.0  ;;  %v1123_v55 = vmax.f32 %v1059_v36, 0.0  ;;  %v1025_v56 = vadd.f32 %v2257_v62, %v954_v43  ;;  %v1057_v4 = vadd.f32 %v2257_v62, %v986_v44  ;;  %v2505_v43 = vpop.f32.mrf.mxu1 }
 0x124   :  { %v1232_v5 = vadd.f32 %v2277_v26, %v1161_v37  ;;  %v1264_v50 = vadd.f32 %v2277_v26, %v1193_v38  ;;  %v1159_v51 = vmul.f32 %v2268_v15, %v1088_v39  ;;  %v1191_v52 = vmul.f32 %v2268_v15, %v1120_v42  ;;  %v990_v31 = vld [vmem:[#allocation2 + $0x188] sm:$0xff] }
 0x125   :  { %v1162_v53 = vmul.f32 %v2268_v15, %v1091_v47  ;;  %v1194_v58 = vmul.f32 %v2268_v15, %v1123_v55  ;;  %v1089_v59 = vmax.f32 %v1025_v56, 0.0  ;;  %v1121_v60 = vmax.f32 %v1057_v4, 0.0 }
 0x126   :  { %v1769_v0 = vpack.c.bf16 %v1232_v5, %v1232_v5  ;;  %v1801_v28 = vpack.c.bf16 %v1264_v50, %v1264_v50  ;;  %v1230_v29 = vadd.f32 %v2277_v26, %v1159_v51  ;;  %v1262_v1 = vadd.f32 %v2277_v26, %v1191_v52  ;;  %v2521_v52 = vpop.f32.mrf.mxu0 }
 0x127   :  { %v1233_v2 = vadd.f32 %v2277_v26, %v1162_v53  ;;  %v1265_v3 = vadd.f32 %v2277_v26, %v1194_v58  ;;  %v1160_v6 = vmul.f32 %v2268_v15, %v1089_v59  ;;  %v1192_v7 = vmul.f32 %v2268_v15, %v1121_v60  ;;  %v2523_v53 = vpop.f32.mrf.mxu1 }
 0x128   :  { %1553 = vst.msk [vmem:[#allocation8 + $0x38] sm:$0xf] %vm1538_vm2, %v1769_v0  ;;  %1585 = vst.msk [vmem:[#allocation8 + $0xb8] sm:$0xf] %vm1538_vm2, %v1801_v28  ;;  %v1767_v11 = vpack.c.bf16 %v1230_v29, %v1230_v29  ;;  %v1799_v57 = vpack.c.bf16 %v1262_v1, %v1262_v1  ;;  %v1030_v9 = vadd.f32 %v2257_v62, %v959_v61  ;;  %v995_v0 = vld [vmem:[#allocation2 + $0x1b0] sm:$0xff] }
 0x129   :  { %v1062_v10 = vadd.f32 %v2257_v62, %v991_v16  ;;  %v1770_v17 = vpack.c.bf16 %v1233_v2, %v1233_v2  ;;  %v1802_v18 = vpack.c.bf16 %v1265_v3, %v1265_v3  ;;  %v1231_v19 = vadd.f32 %v2277_v26, %v1160_v6  ;;  %v963_v16 = vld [vmem:[#allocation2 + $0xb0] sm:$0xff] }
 0x12a   :  { %v1263_v22 = vadd.f32 %v2277_v26, %v1192_v7  ;;  %1551 = vst.msk [vmem:[#allocation8 + $0x30] sm:$0xf] %vm1538_vm2, %v1767_v11  ;;  %1583 = vst.msk [vmem:[#allocation8 + $0xb0] sm:$0xf] %vm1538_vm2, %v1799_v57  ;;  %v1094_v23 = vmax.f32 %v1030_v9, 0.0  ;;  %v1028_v25 = vadd.f32 %v2257_v62, %v957_v8  ;;  %v1060_v27 = vadd.f32 %v2257_v62, %v989_v54  ;;  %v961_v54 = vld [vmem:[#allocation2 + $0xa0] sm:$0xff] }
 0x12b   :  { %v1126_v24 = vmax.f32 %v1062_v10, 0.0  ;;  %1554 = vst.msk [vmem:[#allocation8 + $0x3c] sm:$0xf] %vm1538_vm2, %v1770_v17  ;;  %1586 = vst.msk [vmem:[#allocation8 + $0xbc] sm:$0xf] %vm1538_vm2, %v1802_v18  ;;  %v1768_v44 = vpack.c.bf16 %v1231_v19, %v1231_v19  ;;  %v1031_v34 = vadd.f32 %v2257_v62, %v960_v12  ;;  %v1063_v35 = vadd.f32 %v2257_v62, %v992_v13  ;;  %v993_v11 = vld [vmem:[#allocation2 + $0x1a0] sm:$0xff]  ;;  %v2537_v18 = vpop.f32.mrf.mxu0  ;;  %v2539_v19 = vpop.f32.mrf.mxu1 }
 0x12c   :  { %v1800_v33 = vpack.c.bf16 %v1263_v22, %v1263_v22  ;;  %v1165_v36 = vmul.f32 %v2268_v15, %v1094_v23  ;;  %v1092_v38 = vmax.f32 %v1028_v25, 0.0  ;;  %v1124_v39 = vmax.f32 %v1060_v27, 0.0  ;;  %v202_v13 = vld [vmem:[#allocation2 + $0xb8] sm:$0xff]  ;;  %v200_v27 = vld [vmem:[#allocation2 + $0xa8] sm:$0xff] }
 0x12d   :  { %v1197_v37 = vmul.f32 %v2268_v15, %v1126_v24  ;;  %1552 = vst.msk [vmem:[#allocation8 + $0x34] sm:$0xf] %vm1538_vm2, %v1768_v44  ;;  %v1095_v42 = vmax.f32 %v1031_v34, 0.0  ;;  %v1127_v47 = vmax.f32 %v1063_v35, 0.0  ;;  %v1029_v55 = vadd.f32 %v2257_v62, %v958_v30  ;;  %v234_v17 = vld [vmem:[#allocation2 + $0x1b8] sm:$0xff]  ;;  %v232_v34 = vld [vmem:[#allocation2 + $0x1a8] sm:$0xff] }
 0x12e   :  { %1584 = vst.msk [vmem:[#allocation8 + $0xb4] sm:$0xf] %vm1538_vm2, %v1800_v33  ;;  %v1061_v56 = vadd.f32 %v2257_v62, %v990_v31  ;;  %v1236_v4 = vadd.f32 %v2277_v26, %v1165_v36  ;;  %v1163_v50 = vmul.f32 %v2268_v15, %v1092_v38  ;;  %v1195_v51 = vmul.f32 %v2268_v15, %v1124_v39  ;;  %v205_v35 = vld [vmem:[#allocation2 + $0xd0] sm:$0xff] }
 0x12f   :  { %v1268_v5 = vadd.f32 %v2277_v26, %v1197_v37  ;;  %v1166_v58 = vmul.f32 %v2268_v15, %v1095_v42  ;;  %v1198_v59 = vmul.f32 %v2268_v15, %v1127_v47  ;;  %v1093_v60 = vmax.f32 %v1029_v55, 0.0  ;;  %v237_v36 = vld [vmem:[#allocation2 + $0x1d0] sm:$0xff]  ;;  %v203_v47 = vld [vmem:[#allocation2 + $0xc0] sm:$0xff] }
 0x130   :  { %v1125_v61 = vmax.f32 %v1061_v56, 0.0  ;;  %v1773_v28 = vpack.c.bf16 %v1236_v4, %v1236_v4  ;;  %v1234_v1 = vadd.f32 %v2277_v26, %v1163_v50  ;;  %v1266_v2 = vadd.f32 %v2277_v26, %v1195_v51  ;;  %v206_v50 = vld [vmem:[#allocation2 + $0xd8] sm:$0xff] }
 0x131   :  { %v1805_v29 = vpack.c.bf16 %v1268_v5, %v1268_v5  ;;  %v1237_v3 = vadd.f32 %v2277_v26, %v1166_v58  ;;  %v1269_v6 = vadd.f32 %v2277_v26, %v1198_v59  ;;  %v1164_v7 = vmul.f32 %v2268_v15, %v1093_v60  ;;  %v235_v5 = vld [vmem:[#allocation2 + $0x1c0] sm:$0xff]  ;;  %v238_v51 = vld [vmem:[#allocation2 + $0x1d8] sm:$0xff]  ;;  %v1891_v58 = vpop.f32.mrf.mxu0  ;;  %v1923_v59 = vpop.f32.mrf.mxu1 }
 0x132   :  { %v1196_v8 = vmul.f32 %v2268_v15, %v1125_v61  ;;  %1557 = vst.msk [vmem:[#allocation8 + $0x48] sm:$0xf] %vm1538_vm2, %v1773_v28  ;;  %v1771_v57 = vpack.c.bf16 %v1234_v1, %v1234_v1  ;;  %v1803_v9 = vpack.c.bf16 %v1266_v2, %v1266_v2  ;;  %v1034_v10 = vadd.f32 %v2257_v62, %v963_v16  ;;  %v204_v16 = vld [vmem:[#allocation2 + $0xc8] sm:$0xff] }
 0x133   :  { %1589 = vst.msk [vmem:[#allocation8 + $0xc8] sm:$0xf] %vm1538_vm2, %v1805_v29  ;;  %v1066_v12 = vadd.f32 %v2257_v62, %v995_v0  ;;  %v1774_v22 = vpack.c.bf16 %v1237_v3, %v1237_v3  ;;  %v1806_v23 = vpack.c.bf16 %v1269_v6, %v1269_v6  ;;  %v1235_v24 = vadd.f32 %v2277_v26, %v1164_v7  ;;  %v236_v2 = vld [vmem:[#allocation2 + $0x1c8] sm:$0xff]  ;;  %v209_v3 = vld [vmem:[#allocation2 + $0xf0] sm:$0xff]  ;;  %v239_v7 = vld [vmem:[#allocation2 + $0x1e0] sm:$0xff] }
 0x134   :  { %v1267_v25 = vadd.f32 %v2277_v26, %v1196_v8  ;;  %1555 = vst.msk [vmem:[#allocation8 + $0x40] sm:$0xf] %vm1538_vm2, %v1771_v57  ;;  %1587 = vst.msk [vmem:[#allocation8 + $0xc0] sm:$0xf] %vm1538_vm2, %v1803_v9  ;;  %v1098_v30 = vmax.f32 %v1034_v10, 0.0  ;;  %v1032_v44 = vadd.f32 %v2257_v62, %v961_v54  ;;  %v1064_v33 = vadd.f32 %v2257_v62, %v993_v11  ;;  %v241_v6 = vld [vmem:[#allocation2 + $0x1f0] sm:$0xff] }
 0x135   :  { %v1130_v31 = vmax.f32 %v1066_v12, 0.0  ;;  %1558 = vst.msk [vmem:[#allocation8 + $0x4c] sm:$0xf] %vm1538_vm2, %v1774_v22  ;;  %1590 = vst.msk [vmem:[#allocation8 + $0xcc] sm:$0xf] %vm1538_vm2, %v1806_v23  ;;  %v1772_v37 = vpack.c.bf16 %v1235_v24, %v1235_v24  ;;  %v836_v39 = vadd.f32 %v2423_v48, %v202_v13  ;;  %v868_v42 = vadd.f32 %v2425_v49, %v234_v17  ;;  %v210_v8 = vld [vmem:[#allocation2 + $0xf8] sm:$0xff]  ;;  %v673_v13 = vpop.f32.mrf.mxu0 }
 0x136   :  { %v1804_v38 = vpack.c.bf16 %v1267_v25, %v1267_v25  ;;  %v1169_v55 = vmul.f32 %v2268_v15, %v1098_v30  ;;  %v1096_v4 = vmax.f32 %v1032_v44, 0.0  ;;  %v1128_v62 = vmax.f32 %v1064_v33, 0.0  ;;  %v242_v10 = vld [vmem:[#allocation2 + $0x1f8] sm:$0xff]  ;;  %v208_v12 = vld [vmem:[#allocation2 + $0xe8] sm:$0xff] }
 0x137   :  { %v1201_v56 = vmul.f32 %v2268_v15, %v1130_v31  ;;  %1556 = vst.msk [vmem:[#allocation8 + $0x44] sm:$0xf] %vm1538_vm2, %v1772_v37  ;;  %v834_v48 = vadd.f32 %v2437_v14, %v200_v27  ;;  %v866_v49 = vadd.f32 %v2439_v63, %v232_v34  ;;  %v839_v60 = vadd.f32 %v2453_v20, %v205_v35  ;;  %v240_v17 = vld [vmem:[#allocation2 + $0x1e8] sm:$0xff] }
 0x138   :  { %1588 = vst.msk [vmem:[#allocation8 + $0xc4] sm:$0xf] %vm1538_vm2, %v1804_v38  ;;  %v871_v61 = vadd.f32 %v2455_v21, %v237_v36  ;;  %v1240_v0 = vadd.f32 %v2277_v26, %v1169_v55  ;;  %v1167_v29 = vmul.f32 %v2268_v15, %v1096_v4  ;;  %v1199_v1 = vmul.f32 %v2268_v15, %v1128_v62  ;;  %v207_v15 = vld [vmem:[#allocation2 + $0xe0] sm:$0xff] }
 0x139   :  { %900 = vst.msk [vmem:[#allocation2 + $0xb8] sm:$0xff] %vm50_vm0, %v836_v39  ;;  %932 = vst.msk [vmem:[#allocation2 + $0x1b8] sm:$0xff] %vm50_vm0, %v868_v42  ;;  %v1272_v28 = vadd.f32 %v2277_v26, %v1201_v56  ;;  %v837_v14 = vadd.f32 %v2469_v45, %v203_v47  ;;  %v869_v63 = vadd.f32 %v2471_v46, %v235_v5  ;;  %v801_v45 = vpop.f32.mrf.mxu1  ;;  %v2613_v4 = vld [vmem:[%s2703_s3] ss:$0 sm:$0xff]  ;;  %s2045_s3 = smov [#allocation8]  }
 0x13a   :  { %898 = vst.msk [vmem:[#allocation2 + $0xa8] sm:$0xff] %vm50_vm0, %v834_v48  ;;  %930 = vst.msk [vmem:[#allocation2 + $0x1a8] sm:$0xff] %vm50_vm0, %v866_v49  ;;  %v840_v20 = vadd.f32 %v2485_v40, %v206_v50  ;;  %v872_v21 = vadd.f32 %v2487_v41, %v238_v51  ;;  %v1777_v54 = vpack.c.bf16 %v1240_v0, %v1240_v0 }
 0x13b   :  { %903 = vst.msk [vmem:[#allocation2 + $0xd0] sm:$0xff] %vm50_vm0, %v839_v60  ;;  %935 = vst.msk [vmem:[#allocation2 + $0x1d0] sm:$0xff] %vm50_vm0, %v871_v61  ;;  %v1809_v11 = vpack.c.bf16 %v1272_v28, %v1272_v28  ;;  %v1238_v57 = vadd.f32 %v2277_v26, %v1167_v29  ;;  %v1270_v9 = vadd.f32 %v2277_v26, %v1199_v1  ;;  %v2622_v60 = vld [vmem:[%s2704_s4] ss:$0 sm:$0xff]  ;;  %s1608_s4 = sshll.u32 %s2045_s3, 4  ;;  %s1609_s4 = int_to_ptr.vmem [resolvable:$true] %s1608_s4 }
 0x13c   :  { %901 = vst.msk [vmem:[#allocation2 + $0xc0] sm:$0xff] %vm50_vm0, %v837_v14  ;;  %933 = vst.msk [vmem:[#allocation2 + $0x1c0] sm:$0xff] %vm50_vm0, %v869_v63  ;;  %v838_v46 = vadd.f32 %v2503_v32, %v204_v16  ;;  %v870_v40 = vadd.f32 %v2505_v43, %v236_v2  ;;  %v843_v41 = vadd.f32 %v2521_v52, %v209_v3  ;;  %s2014_s14 = scalar_lea.vmem %s1609_s4, 4096  ;;  %p2019_p11 = scmp.lt.s32.totalorder %s1609_s4, %s1609_s4 }
 0x13d   :  { %904 = vst.msk [vmem:[#allocation2 + $0xd8] sm:$0xff] %vm50_vm0, %v840_v20  ;;  %936 = vst.msk [vmem:[#allocation2 + $0x1d8] sm:$0xff] %vm50_vm0, %v872_v21  ;;  %v875_v26 = vadd.f32 %v2523_v53, %v241_v6  ;;  %v1775_v22 = vpack.c.bf16 %v1238_v57, %v1238_v57  ;;  %v1807_v23 = vpack.c.bf16 %v1270_v9, %v1270_v9  ;;  %p2015_p10 = scmp.ne.s32.totalorder %s1609_s4, %s2014_s14  ;;  %p2020_p12 = scmp.lt.s32.totalorder %s2014_s14, %s2014_s14 }
 0x13e   :  { %1561 = vst.msk [vmem:[#allocation8 + $0x58] sm:$0xf] %vm1538_vm2, %v1777_v54  ;;  %1593 = vst.msk [vmem:[#allocation8 + $0xd8] sm:$0xf] %vm1538_vm2, %v1809_v11  ;;  %v841_v24 = vadd.f32 %v2537_v18, %v207_v15  ;;  %v873_v25 = vadd.f32 %v2539_v19, %v239_v7  ;;  %v844_v32 = vadd.f32 %v1891_v58, %v210_v8  ;;  %v2598_v19 = vld [vmem:[%s2702_s2] ss:$0 sm:$0xff] }
 0x13f   :  { %902 = vst.msk [vmem:[#allocation2 + $0xc8] sm:$0xff] %vm50_vm0, %v838_v46  ;;  %934 = vst.msk [vmem:[#allocation2 + $0x1c8] sm:$0xff] %vm50_vm0, %v870_v40  ;;  %v876_v43 = vadd.f32 %v1923_v59, %v242_v10  ;;  %v842_v52 = vadd.f32 %v673_v13, %v208_v12  ;;  %v874_v53 = vadd.f32 %v801_v45, %v240_v17  ;;  %p2021_p13 = por %p2020_p12, %p2019_p11 }
 0x140   :  { %907 = vst.msk [vmem:[#allocation2 + $0xf0] sm:$0xff] %vm50_vm0, %v843_v41  ;;  %939 = vst.msk [vmem:[#allocation2 + $0x1f0] sm:$0xff] %vm50_vm0, %v875_v26  ;;  %v964_v27 = vld [vmem:[#allocation2 + $0xb8] sm:$0xff] }
 0x141   :  { %1559 = vst.msk [vmem:[#allocation8 + $0x50] sm:$0xf] %vm1538_vm2, %v1775_v22  ;;  %1591 = vst.msk [vmem:[#allocation8 + $0xd0] sm:$0xf] %vm1538_vm2, %v1807_v23  ;;  %v996_v18 = vld [vmem:[#allocation2 + $0x1b8] sm:$0xff]  ;;  %v1035_v30 = vadd.f32 %v2598_v19, %v964_v27  ;;  %v962_v44 = vld [vmem:[#allocation2 + $0xa8] sm:$0xff]  ;;  %p2022_p0 = pnand %p2021_p13, %p2015_p10 }
 0x142   :  { %905 = vst.msk [vmem:[#allocation2 + $0xe0] sm:$0xff] %vm50_vm0, %v841_v24  ;;  %937 = vst.msk [vmem:[#allocation2 + $0x1e0] sm:$0xff] %vm50_vm0, %v873_v25  ;;  %v1067_v31 = vadd.f32 %v2598_v19, %v996_v18  ;;  %v994_v33 = vld [vmem:[#allocation2 + $0x1a8] sm:$0xff]  ;;  %v967_v34 = vld [vmem:[#allocation2 + $0xd0] sm:$0xff]  ;;  %v1033_v37 = vadd.f32 %v2598_v19, %v962_v44 }
 0x143   :  { %908 = vst.msk [vmem:[#allocation2 + $0xf8] sm:$0xff] %vm50_vm0, %v844_v32  ;;  %940 = vst.msk [vmem:[#allocation2 + $0x1f8] sm:$0xff] %vm50_vm0, %v876_v43  ;;  %v1099_v35 = vmax.f32 %v1035_v30, 0.0  ;;  %v1065_v38 = vadd.f32 %v2598_v19, %v994_v33  ;;  %v999_v39 = vld [vmem:[#allocation2 + $0x1d0] sm:$0xff]  ;;  %v1038_v42 = vadd.f32 %v2598_v19, %v967_v34  ;;  %v965_v55 = vld [vmem:[#allocation2 + $0xc0] sm:$0xff] }
 0x144   :  { %906 = vst.msk [vmem:[#allocation2 + $0xe8] sm:$0xff] %vm50_vm0, %v842_v52  ;;  %938 = vst.msk [vmem:[#allocation2 + $0x1e8] sm:$0xff] %vm50_vm0, %v874_v53  ;;  %v1131_v36 = vmax.f32 %v1067_v31, 0.0  ;;  %v1070_v47 = vadd.f32 %v2598_v19, %v999_v39  ;;  %v997_v56 = vld [vmem:[#allocation2 + $0x1c0] sm:$0xff]  ;;  %v1097_v50 = vmax.f32 %v1033_v37, 0.0  ;;  %v1036_v48 = vadd.f32 %v2598_v19, %v965_v55  ;;  %v968_v6 = vld [vmem:[#allocation2 + $0xd8] sm:$0xff] }
 0x145   :  { %v1170_v62 = vmul.f32 %v2613_v4, %v1099_v35  ;;  %v1129_v51 = vmax.f32 %v1065_v38, 0.0  ;;  %v1102_v58 = vmax.f32 %v1038_v42, 0.0  ;;  %v1068_v49 = vadd.f32 %v2598_v19, %v997_v56  ;;  %v1000_v14 = vld [vmem:[#allocation2 + $0x1d8] sm:$0xff] }
 0x146   :  { %v1202_v5 = vmul.f32 %v2613_v4, %v1131_v36  ;;  %v1134_v59 = vmax.f32 %v1070_v47, 0.0  ;;  %v1168_v0 = vmul.f32 %v2613_v4, %v1097_v50  ;;  %v1100_v2 = vmax.f32 %v1036_v48, 0.0  ;;  %v966_v57 = vld [vmem:[#allocation2 + $0xc8] sm:$0xff] }
 0x147   :  { %v1241_v61 = vadd.f32 %v2622_v60, %v1170_v62  ;;  %v1200_v28 = vmul.f32 %v2613_v4, %v1129_v51  ;;  %v1173_v29 = vmul.f32 %v2613_v4, %v1102_v58  ;;  %v1132_v3 = vmax.f32 %v1068_v49, 0.0  ;;  %v998_v9 = vld [vmem:[#allocation2 + $0x1c8] sm:$0xff]  ;;  %v971_v45 = vld [vmem:[#allocation2 + $0xf0] sm:$0xff] }
 0x148   :  { %v1273_v16 = vadd.f32 %v2622_v60, %v1202_v5  ;;  %v1205_v1 = vmul.f32 %v2613_v4, %v1134_v59  ;;  %v1239_v21 = vadd.f32 %v2622_v60, %v1168_v0  ;;  %v1171_v54 = vmul.f32 %v2613_v4, %v1100_v2  ;;  %v1003_v46 = vld [vmem:[#allocation2 + $0x1f0] sm:$0xff] }
 0x149   :  { %v1778_v63 = vpack.c.bf16 %v1241_v61, %v1241_v61  ;;  %v1271_v15 = vadd.f32 %v2622_v60, %v1200_v28  ;;  %v1244_v7 = vadd.f32 %v2622_v60, %v1173_v29  ;;  %v1203_v11 = vmul.f32 %v2613_v4, %v1132_v3  ;;  %v969_v43 = vld [vmem:[#allocation2 + $0xe0] sm:$0xff] }
 0x14a   :  { %v1810_v20 = vpack.c.bf16 %v1273_v16, %v1273_v16  ;;  %v1276_v8 = vadd.f32 %v2622_v60, %v1205_v1  ;;  %v1776_v10 = vpack.c.bf16 %v1239_v21, %v1239_v21  ;;  %v1039_v13 = vadd.f32 %v2598_v19, %v968_v6  ;;  %v1001_v52 = vld [vmem:[#allocation2 + $0x1e0] sm:$0xff]  ;;  %v972_v51 = vld [vmem:[#allocation2 + $0xf8] sm:$0xff] }
 0x14b   :  { %1562 = vst.msk [vmem:[#allocation8 + $0x5c] sm:$0xf] %vm1538_vm2, %v1778_v63  ;;  %v1808_v12 = vpack.c.bf16 %v1271_v15, %v1271_v15  ;;  %v1071_v17 = vadd.f32 %v2598_v19, %v1000_v14  ;;  %v1781_v40 = vpack.c.bf16 %v1244_v7, %v1244_v7  ;;  %v1242_v26 = vadd.f32 %v2622_v60, %v1171_v54  ;;  %v1004_v58 = vld [vmem:[#allocation2 + $0x1f8] sm:$0xff]  ;;  %v970_v1 = vld [vmem:[#allocation2 + $0xe8] sm:$0xff] }
 0x14c   :  { %1594 = vst.msk [vmem:[#allocation8 + $0xdc] sm:$0xf] %vm1538_vm2, %v1810_v20  ;;  %v1813_v41 = vpack.c.bf16 %v1276_v8, %v1276_v8  ;;  %v1274_v22 = vadd.f32 %v2622_v60, %v1203_v11  ;;  %1560 = vst.msk [vmem:[#allocation8 + $0x54] sm:$0xf] %vm1538_vm2, %v1776_v10  ;;  %v1103_v23 = vmax.f32 %v1039_v13, 0.0  ;;  %v1037_v25 = vadd.f32 %v2598_v19, %v966_v57  ;;  %v1002_v2 = vld [vmem:[#allocation2 + $0x1e8] sm:$0xff] }
 0x14d   :  { %1592 = vst.msk [vmem:[#allocation8 + $0xd4] sm:$0xf] %vm1538_vm2, %v1808_v12  ;;  %v1135_v24 = vmax.f32 %v1071_v17, 0.0  ;;  %v1069_v32 = vadd.f32 %v2598_v19, %v998_v9  ;;  %1565 = vst.msk [vmem:[#allocation8 + $0x68] sm:$0xf] %vm1538_vm2, %v1781_v40  ;;  %v1779_v53 = vpack.c.bf16 %v1242_v26, %v1242_v26  ;;  %v1042_v18 = vadd.f32 %v2598_v19, %v971_v45 }
 0x14e   :  { %1597 = vst.msk [vmem:[#allocation8 + $0xe8] sm:$0xf] %vm1538_vm2, %v1813_v41  ;;  %v1811_v27 = vpack.c.bf16 %v1274_v22, %v1274_v22  ;;  %v1074_v30 = vadd.f32 %v2598_v19, %v1003_v46  ;;  %v1174_v31 = vmul.f32 %v2613_v4, %v1103_v23  ;;  %v1101_v33 = vmax.f32 %v1037_v25, 0.0 }
 0x14f   :  { %v1206_v44 = vmul.f32 %v2613_v4, %v1135_v24  ;;  %v1133_v34 = vmax.f32 %v1069_v32, 0.0  ;;  %1563 = vst.msk [vmem:[#allocation8 + $0x60] sm:$0xf] %vm1538_vm2, %v1779_v53  ;;  %v1106_v35 = vmax.f32 %v1042_v18, 0.0  ;;  %v1040_v37 = vadd.f32 %v2598_v19, %v969_v43 }
 0x150   :  { %1595 = vst.msk [vmem:[#allocation8 + $0xe0] sm:$0xf] %vm1538_vm2, %v1811_v27  ;;  %v1138_v36 = vmax.f32 %v1074_v30, 0.0  ;;  %v1072_v38 = vadd.f32 %v2598_v19, %v1001_v52  ;;  %v1245_v39 = vadd.f32 %v2622_v60, %v1174_v31  ;;  %v1172_v47 = vmul.f32 %v2613_v4, %v1101_v33 }
 0x151   :  { %v1277_v42 = vadd.f32 %v2622_v60, %v1206_v44  ;;  %v1204_v55 = vmul.f32 %v2613_v4, %v1133_v34  ;;  %v1177_v56 = vmul.f32 %v2613_v4, %v1106_v35  ;;  %v1104_v5 = vmax.f32 %v1040_v37, 0.0 }
 0x152   :  { %v1209_v62 = vmul.f32 %v2613_v4, %v1138_v36  ;;  %v1136_v50 = vmax.f32 %v1072_v38, 0.0  ;;  %v1782_v59 = vpack.c.bf16 %v1245_v39, %v1245_v39  ;;  %v1243_v49 = vadd.f32 %v2622_v60, %v1172_v47 }
 0x153   :  { %v1814_v48 = vpack.c.bf16 %v1277_v42, %v1277_v42  ;;  %v1275_v61 = vadd.f32 %v2622_v60, %v1204_v55  ;;  %v1248_v16 = vadd.f32 %v2622_v60, %v1177_v56  ;;  %v1175_v28 = vmul.f32 %v2613_v4, %v1104_v5 }
 0x154   :  { %v1280_v0 = vadd.f32 %v2622_v60, %v1209_v62  ;;  %v1207_v29 = vmul.f32 %v2613_v4, %v1136_v50  ;;  %1566 = vst.msk [vmem:[#allocation8 + $0x6c] sm:$0xf] %vm1538_vm2, %v1782_v59  ;;  %v1780_v3 = vpack.c.bf16 %v1243_v49, %v1243_v49  ;;  %v1043_v14 = vadd.f32 %v2598_v19, %v972_v51 }
 0x155   :  { %1598 = vst.msk [vmem:[#allocation8 + $0xec] sm:$0xf] %vm1538_vm2, %v1814_v48  ;;  %v1812_v6 = vpack.c.bf16 %v1275_v61, %v1275_v61  ;;  %v1075_v63 = vadd.f32 %v2598_v19, %v1004_v58  ;;  %v1785_v20 = vpack.c.bf16 %v1248_v16, %v1248_v16  ;;  %v1246_v15 = vadd.f32 %v2622_v60, %v1175_v28 }
 0x156   :  { %v1817_v21 = vpack.c.bf16 %v1280_v0, %v1280_v0  ;;  %v1278_v7 = vadd.f32 %v2622_v60, %v1207_v29  ;;  %1564 = vst.msk [vmem:[#allocation8 + $0x64] sm:$0xf] %vm1538_vm2, %v1780_v3  ;;  %v1107_v8 = vmax.f32 %v1043_v14, 0.0  ;;  %v1041_v11 = vadd.f32 %v2598_v19, %v970_v1 }
 0x157   :  { %1596 = vst.msk [vmem:[#allocation8 + $0xe4] sm:$0xf] %vm1538_vm2, %v1812_v6  ;;  %v1139_v54 = vmax.f32 %v1075_v63, 0.0  ;;  %v1073_v57 = vadd.f32 %v2598_v19, %v1002_v2  ;;  %1569 = vst.msk [vmem:[#allocation8 + $0x78] sm:$0xf] %vm1538_vm2, %v1785_v20  ;;  %v1783_v9 = vpack.c.bf16 %v1246_v15, %v1246_v15 }
 0x158   :  { %1601 = vst.msk [vmem:[#allocation8 + $0xf8] sm:$0xf] %vm1538_vm2, %v1817_v21  ;;  %v1815_v10 = vpack.c.bf16 %v1278_v7, %v1278_v7  ;;  %v1178_v12 = vmul.f32 %v2613_v4, %v1107_v8  ;;  %v1105_v17 = vmax.f32 %v1041_v11, 0.0 }
 0x159   :  { %v1210_v13 = vmul.f32 %v2613_v4, %v1139_v54  ;;  %v1137_v45 = vmax.f32 %v1073_v57, 0.0  ;;  %1567 = vst.msk [vmem:[#allocation8 + $0x70] sm:$0xf] %vm1538_vm2, %v1783_v9 }
 0x15a   :  { %1599 = vst.msk [vmem:[#allocation8 + $0xf0] sm:$0xf] %vm1538_vm2, %v1815_v10  ;;  %v1249_v46 = vadd.f32 %v2622_v60, %v1178_v12  ;;  %v1176_v40 = vmul.f32 %v2613_v4, %v1105_v17 }
 0x15b   :  { %v1281_v19 = vadd.f32 %v2622_v60, %v1210_v13  ;;  %v1208_v41 = vmul.f32 %v2613_v4, %v1137_v45 }
 0x15c   :  { %v1786_v26 = vpack.c.bf16 %v1249_v46, %v1249_v46  ;;  %v1247_v23 = vadd.f32 %v2622_v60, %v1176_v40 }
 0x15d   :  { %v1818_v22 = vpack.c.bf16 %v1281_v19, %v1281_v19  ;;  %v1279_v24 = vadd.f32 %v2622_v60, %v1208_v41 }
 0x15e   :  { %1570 = vst.msk [vmem:[#allocation8 + $0x7c] sm:$0xf] %vm1538_vm2, %v1786_v26  ;;  %v1784_v25 = vpack.c.bf16 %v1247_v23, %v1247_v23 }
 0x15f   :  { %1602 = vst.msk [vmem:[#allocation8 + $0xfc] sm:$0xf] %vm1538_vm2, %v1818_v22  ;;  %v1816_v32 = vpack.c.bf16 %v1279_v24, %v1279_v24 }
 0x160   :  { %1568 = vst.msk [vmem:[#allocation8 + $0x74] sm:$0xf] %vm1538_vm2, %v1784_v25 }
 0x161   :  { %1600 = vst.msk [vmem:[#allocation8 + $0xf4] sm:$0xf] %vm1538_vm2, %v1816_v32 }
 0x162   :  { %2025 = shalt.err (!%p2022_p0)
}
 0x163   :  { %1614 = dma.vmem_to_hbm [thread:$0]  %s1609_s4, 4096, %s2705_s5, [#allocation5], %s2041_s21, %s2041_s21, %s2042_s22  }
 0x164   :  { %2038 = dma.done.wait [#allocation5], 4096  }
 0x165   :  { %2039 = vsyncadd [#allocation5], 4294963200 }
 0x166   :  { %1618 = vsyncpa [#allocation4], 1 }
 0x167   :  { %1619 = vsyncpa [#allocation7], 1 }
 0x168   :  { %1620 = vsyncpa [#allocation5], 1 }

</bundles_post_ra>
